<compile_context>
chip_gen: v7x
topology: tpu7x:2x2x1
jax: 0.10.0
libtpu: 0.0.40
codegen_flags: <defaults>
</compile_context>

<pallas_src>
import functools

import jax
import jax.numpy as jnp
from jax.experimental import pallas as pl
from jax.experimental.pallas import tpu as pltpu

LN_EPS = 1e-6


def _layernorm(x, gamma, beta):
    """LayerNorm over the last dim, f32 statistics, rsqrt on the EUP."""
    mu = jnp.mean(x, axis=-1, keepdims=True)
    var = jnp.mean(jnp.square(x - mu), axis=-1, keepdims=True)
    return (x - mu) * jax.lax.rsqrt(var + LN_EPS) * gamma + beta


# ---------------------------------------------------------------------------
# Fused kernel: patch-embed ("layer -1") + all EncoderLayers, one pallas_call
# ---------------------------------------------------------------------------
def fused_encoder_kernel(
    xp_ref,                                    # (Mb, K) bf16 patch pixels
    pw_ref, pb_ref, plg_ref, plb_ref,          # patch proj + embedding LN
    wq_ref, bq_ref, wk_ref, bk_ref,            # (1,H,D,dk) / (1,H,1,dk)
    wv_ref, bv_ref, wo_ref, bo_ref,            # (1,H,D,dv) / (1,H,dv,D) / (1,1,D)
    ln1g_ref, ln1b_ref,
    w1_ref, b1_ref, w2_ref, b2_ref,
    ln2g_ref, ln2b_ref,
    out_ref,                                   # (Mb, D) f32
    h_ref,                                     # VMEM scratch (Mb, D) f32
    *, n_head, d_k, d_v, bb, n_tok,
):
    layer = pl.program_id(1)
    mb, d_model = h_ref.shape                  # Mb = bb * n_tok

    # ---- "layer -1": patch projection (== Conv2d k=P, s=P) + Dropout + LN ----
    # Dropout is identity at inference. Runs once per batch block.
    @pl.when(layer == 0)
    def _():
        emb = jnp.dot(xp_ref[...], pw_ref[...],
                      preferred_element_type=jnp.float32) + pb_ref[...]
        h_ref[...] = _layernorm(emb, plg_ref[...], plb_ref[...])

    x = h_ref[...]                             # (Mb, D) f32 residual stream
    xb = x.astype(jnp.bfloat16)

    # ---------------- multi-head self-attention (post-LN residual) ----------
    inv_temp = 1.0 / (float(d_k) ** 0.5)
    attn = jnp.zeros((mb, d_model), jnp.float32)
    for hd in range(n_head):                   # static; head-major weights =>
        # no lane slicing, no transpose, no concatenate.
        q = jnp.dot(xb, wq_ref[0, hd], preferred_element_type=jnp.float32) + bq_ref[0, hd]
        k = jnp.dot(xb, wk_ref[0, hd], preferred_element_type=jnp.float32) + bk_ref[0, hd]
        v = jnp.dot(xb, wv_ref[0, hd], preferred_element_type=jnp.float32) + bv_ref[0, hd]
        q = (q * inv_temp).reshape(bb, n_tok, d_k).astype(jnp.bfloat16)
        k = k.reshape(bb, n_tok, d_k).astype(jnp.bfloat16)
        v = v.reshape(bb, n_tok, d_v).astype(jnp.bfloat16)
        # per-batch block-diagonal attention (tokens never attend across batch)
        s = jnp.einsum('bqc,bkc->bqk', q, k, preferred_element_type=jnp.float32)
        s = s - jnp.max(s, axis=-1, keepdims=True)
        p = jnp.exp(s)
        p = p * pl.reciprocal(jnp.sum(p, axis=-1, keepdims=True), approx=True)
        ctx = jnp.einsum('bqk,bkd->bqd', p.astype(jnp.bfloat16), v,
                         preferred_element_type=jnp.float32)
        ctx = ctx.reshape(mb, d_v).astype(jnp.bfloat16)
        # summing per-head output projections replaces the concatenate
        attn = attn + jnp.dot(ctx, wo_ref[0, hd], preferred_element_type=jnp.float32)
    attn = attn + bo_ref[0]
    x1 = _layernorm(attn + x, ln1g_ref[0], ln1b_ref[0])      # dropout = identity

    # ---------------- position-wise feed-forward (post-LN residual) ---------
    hdn = jnp.dot(x1.astype(jnp.bfloat16), w1_ref[0],
                  preferred_element_type=jnp.float32) + b1_ref[0]
    hdn = jnp.maximum(hdn, 0.0)
    y = jnp.dot(hdn.astype(jnp.bfloat16), w2_ref[0],
                preferred_element_type=jnp.float32) + b2_ref[0]
    x2 = _layernorm(y + x1, ln2g_ref[0], ln2b_ref[0])        # dropout = identity

    h_ref[...] = x2                            # stays resident for next layer

    @pl.when(layer == pl.num_programs(1) - 1)
    def _():
        out_ref[...] = x2.astype(out_ref.dtype)


# ---------------------------------------------------------------------------
# JAX glue: patch extraction, parameter init, full forward
# ---------------------------------------------------------------------------
def extract_patches(x, patch):
    """NCHW image -> (B, N, C*P*P), matching Conv2d(k=P, stride=P) flattening."""
    B, C, H, W = x.shape
    gh, gw = H // patch, W // patch
    x = x.reshape(B, C, gh, patch, gw, patch)
    x = x.transpose(0, 2, 4, 1, 3, 5)                      # (B, gh, gw, C, P, P)
    return x.reshape(B, gh * gw, C * patch * patch)


def get_patch_positions(img_size, patch):
    """(N, 2) row/col grid positions of patches (computed, unused — see TODO)."""
    g = img_size // patch
    rows = jnp.repeat(jnp.arange(g, dtype=jnp.float32), g)
    cols = jnp.tile(jnp.arange(g, dtype=jnp.float32), g)
    return jnp.stack([rows, cols], axis=-1)


def init_params(key, *, n_layers, n_head, d_k, d_v, d_model, d_inner, c_in, patch):
    keys = iter(jax.random.split(key, 16))
    scale = 0.02
    K = c_in * patch * patch
    wdt = jnp.bfloat16                                      # matmul weights in bf16

    def w(shape):
        return (scale * jax.random.normal(next(keys), shape, jnp.float32)).astype(wdt)

    L, H = n_layers, n_head
    return {
        # patch embedding (Conv2d as matmul) + embedding LayerNorm
        "patch_w": w((K, d_model)),
        "patch_b": jnp.zeros((1, d_model), jnp.float32),
        "ln_g": jnp.ones((1, d_model), jnp.float32),
        "ln_b": jnp.zeros((1, d_model), jnp.float32),
        # per-layer weights, stacked on a leading L axis, head-major where relevant
        "wq": w((L, H, d_model, d_k)), "bq": jnp.zeros((L, H, 1, d_k), jnp.float32),
        "wk": w((L, H, d_model, d_k)), "bk": jnp.zeros((L, H, 1, d_k), jnp.float32),
        "wv": w((L, H, d_model, d_v)), "bv": jnp.zeros((L, H, 1, d_v), jnp.float32),
        "wo": w((L, H, d_v, d_model)), "bo": jnp.zeros((L, 1, d_model), jnp.float32),
        "ln1_g": jnp.ones((L, 1, d_model), jnp.float32),
        "ln1_b": jnp.zeros((L, 1, d_model), jnp.float32),
        "w1": w((L, d_model, d_inner)), "b1": jnp.zeros((L, 1, d_inner), jnp.float32),
        "w2": w((L, d_inner, d_model)), "b2": jnp.zeros((L, 1, d_model), jnp.float32),
        "ln2_g": jnp.ones((L, 1, d_model), jnp.float32),
        "ln2_b": jnp.zeros((L, 1, d_model), jnp.float32),
    }


def encoder_forward(image, params, *, patch, n_head, d_k, d_v, batch_blocks=None):
    B, C, Himg, Wimg = image.shape
    xp = extract_patches(image, patch)                     # (B, N, K) f32
    _, N, K = xp.shape
    xp = xp.reshape(B * N, K).astype(jnp.bfloat16)         # fold batch into M

    D = params["patch_w"].shape[-1]
    L = params["wq"].shape[0]
    d_inner = params["w1"].shape[-1]

    # >= 2 parallel batch blocks keeps both v7x TensorCores busy while still
    # folding the per-block batches into the matmul M dimension.
    if batch_blocks is None:
        batch_blocks = 2 if (B >= 2 and B % 2 == 0) else 1
    bb = B // batch_blocks
    Mb = bb * N

    _positions = get_patch_positions(Wimg, patch)          # unused (see TODO)

    def stacked(arr):      # per-layer stacked weights: advance block along L
        return pl.BlockSpec((1,) + arr.shape[1:],
                            lambda i, l, _n=arr.ndim: (l,) + (0,) * (_n - 1))

    def const(arr):        # constant (patch-embed) params: same block every step
        return pl.BlockSpec(arr.shape, lambda i, l, _n=arr.ndim: (0,) * _n)

    in_specs = [
        pl.BlockSpec((Mb, K), lambda i, l: (i, 0)),        # patch pixels
        const(params["patch_w"]), const(params["patch_b"]),
        const(params["ln_g"]), const(params["ln_b"]),
        stacked(params["wq"]), stacked(params["bq"]),
        stacked(params["wk"]), stacked(params["bk"]),
        stacked(params["wv"]), stacked(params["bv"]),
        stacked(params["wo"]), stacked(params["bo"]),
        stacked(params["ln1_g"]), stacked(params["ln1_b"]),
        stacked(params["w1"]), stacked(params["b1"]),
        stacked(params["w2"]), stacked(params["b2"]),
        stacked(params["ln2_g"]), stacked(params["ln2_b"]),
    ]
    out_spec = pl.BlockSpec((Mb, D), lambda i, l: (i, 0))

    # advisory cost estimate for XLA scheduling
    tok = B * N
    flops = 2 * tok * K * D + L * (
        n_head * 2 * tok * D * (2 * d_k + d_v)             # q, k, v projections
        + n_head * 2 * B * N * N * (d_k + d_v)             # scores + context
        + n_head * 2 * tok * d_v * D                       # output projection
        + 2 * 2 * tok * D * d_inner                        # FFN
    )
    transcendentals = L * (n_head * B * N * N + 4 * tok) + tok
    param_bytes = sum(int(v.size) * v.dtype.itemsize
                      for v in jax.tree_util.tree_leaves(params))
    bytes_accessed = int(xp.size) * 2 + tok * D * 4 + param_bytes

    kernel = functools.partial(fused_encoder_kernel, n_head=n_head, d_k=d_k,
                               d_v=d_v, bb=bb, n_tok=N)

    out_flat = pl.pallas_call(
        kernel,
        out_shape=jax.ShapeDtypeStruct((B * N, D), jnp.float32),
        grid_spec=pltpu.PrefetchScalarGridSpec(
            num_scalar_prefetch=0,
            grid=(batch_blocks, L),
            in_specs=in_specs,
            out_specs=out_spec,
            scratch_shapes=[pltpu.VMEM((Mb, D), jnp.float32)],
        ),
        compiler_params=pltpu.CompilerParams(
            dimension_semantics=("parallel", "arbitrary")),
        cost_estimate=pl.CostEstimate(flops=flops,
                                      transcendentals=transcendentals,
                                      bytes_accessed=bytes_accessed),
    )(
        xp,
        params["patch_w"], params["patch_b"], params["ln_g"], params["ln_b"],
        params["wq"], params["bq"], params["wk"], params["bk"],
        params["wv"], params["bv"], params["wo"], params["bo"],
        params["ln1_g"], params["ln1_b"],
        params["w1"], params["b1"], params["w2"], params["b2"],
        params["ln2_g"], params["ln2_b"],
    )
    return out_flat.reshape(B, N, D)


if __name__ == "__main__":
    # small, module-consistent shapes
    B, C = 4, 3
    IMG, PATCH = 64, 16          # -> N = 16 patches
    D_MODEL, D_INNER = 32, 64
    N_HEAD, D_K, D_V = 2, 16, 16
    N_LAYERS = 2

    key = jax.random.PRNGKey(0)
    k_img, k_par = jax.random.split(key)
    image = jax.random.normal(k_img, (B, C, IMG, IMG), dtype=jnp.float32)
    params = init_params(
        k_par, n_layers=N_LAYERS, n_head=N_HEAD, d_k=D_K, d_v=D_V,
        d_model=D_MODEL, d_inner=D_INNER, c_in=C, patch=PATCH,
    )

    out = encoder_forward(image, params, patch=PATCH, n_head=N_HEAD, d_k=D_K, d_v=D_V)
    out = jax.block_until_ready(out)
    assert out.shape == (B, (IMG // PATCH) ** 2, D_MODEL)
    assert jnp.all(jnp.isfinite(out))
    print("KERNEL_OK")
</pallas_src>

<mosaic_0001>
module attributes {stable_mosaic.version = 11 : i64} {
  func.func @fused_encoder_kernel(%arg0: i32, %arg1: i32, %arg2: memref<32x768xbf16, #tpu.memory_space<vmem>>, %arg3: memref<768x32xbf16, #tpu.memory_space<vmem>>, %arg4: memref<1x32xf32, #tpu.memory_space<vmem>>, %arg5: memref<1x32xf32, #tpu.memory_space<vmem>>, %arg6: memref<1x32xf32, #tpu.memory_space<vmem>>, %arg7: memref<1x2x32x16xbf16, #tpu.memory_space<vmem>>, %arg8: memref<1x2x1x16xf32, #tpu.memory_space<vmem>>, %arg9: memref<1x2x32x16xbf16, #tpu.memory_space<vmem>>, %arg10: memref<1x2x1x16xf32, #tpu.memory_space<vmem>>, %arg11: memref<1x2x32x16xbf16, #tpu.memory_space<vmem>>, %arg12: memref<1x2x1x16xf32, #tpu.memory_space<vmem>>, %arg13: memref<1x2x16x32xbf16, #tpu.memory_space<vmem>>, %arg14: memref<1x1x32xf32, #tpu.memory_space<vmem>>, %arg15: memref<1x1x32xf32, #tpu.memory_space<vmem>>, %arg16: memref<1x1x32xf32, #tpu.memory_space<vmem>>, %arg17: memref<1x32x64xbf16, #tpu.memory_space<vmem>>, %arg18: memref<1x1x64xf32, #tpu.memory_space<vmem>>, %arg19: memref<1x64x32xbf16, #tpu.memory_space<vmem>>, %arg20: memref<1x1x32xf32, #tpu.memory_space<vmem>>, %arg21: memref<1x1x32xf32, #tpu.memory_space<vmem>>, %arg22: memref<1x1x32xf32, #tpu.memory_space<vmem>>, %arg23: memref<32x32xf32, #tpu.memory_space<vmem>>, %arg24: memref<32x32xf32, #tpu.memory_space<vmem>>) attributes {dimension_semantics = [#tpu.dimension_semantics<parallel>, #tpu.dimension_semantics<arbitrary>], iteration_bounds = array<i64: 2, 2>, scalar_prefetch = 0 : i64, scratch_operands = 1 : i64, tpu.core_type = #tpu.core_type<tc>, window_params = [{transform_indices = @transform_0, window_bounds = array<i64: 32, 768>}, {pipeline_mode = #tpu.pipeline_mode<synchronous>, transform_indices = @transform_1, window_bounds = array<i64: 768, 32>}, {pipeline_mode = #tpu.pipeline_mode<synchronous>, transform_indices = @transform_2, window_bounds = array<i64: 1, 32>}, {pipeline_mode = #tpu.pipeline_mode<synchronous>, transform_indices = @transform_3, window_bounds = array<i64: 1, 32>}, {pipeline_mode = #tpu.pipeline_mode<synchronous>, transform_indices = @transform_4, window_bounds = array<i64: 1, 32>}, {transform_indices = @transform_5, window_bounds = array<i64: 1, 2, 32, 16>}, {transform_indices = @transform_6, window_bounds = array<i64: 1, 2, 1, 16>}, {transform_indices = @transform_7, window_bounds = array<i64: 1, 2, 32, 16>}, {transform_indices = @transform_8, window_bounds = array<i64: 1, 2, 1, 16>}, {transform_indices = @transform_9, window_bounds = array<i64: 1, 2, 32, 16>}, {transform_indices = @transform_10, window_bounds = array<i64: 1, 2, 1, 16>}, {transform_indices = @transform_11, window_bounds = array<i64: 1, 2, 16, 32>}, {transform_indices = @transform_12, window_bounds = array<i64: 1, 1, 32>}, {transform_indices = @transform_13, window_bounds = array<i64: 1, 1, 32>}, {transform_indices = @transform_14, window_bounds = array<i64: 1, 1, 32>}, {transform_indices = @transform_15, window_bounds = array<i64: 1, 32, 64>}, {transform_indices = @transform_16, window_bounds = array<i64: 1, 1, 64>}, {transform_indices = @transform_17, window_bounds = array<i64: 1, 64, 32>}, {transform_indices = @transform_18, window_bounds = array<i64: 1, 1, 32>}, {transform_indices = @transform_19, window_bounds = array<i64: 1, 1, 32>}, {transform_indices = @transform_20, window_bounds = array<i64: 1, 1, 32>}, {transform_indices = @transform_21, window_bounds = array<i64: 32, 32>}]} {
    %c0_i32 = arith.constant 0 : i32
    %0 = arith.cmpi eq, %arg1, %c0_i32 : i32
    %1 = arith.extui %0 : i1 to i32
    %c0_i32_0 = arith.constant 0 : i32
    %2 = arith.cmpi ne, %1, %c0_i32_0 : i32
    scf.if %2 {
      %c0_118 = arith.constant 0 : index
      %c0_119 = arith.constant 0 : index
      %182 = vector.load %arg2[%c0_118, %c0_119] : memref<32x768xbf16, #tpu.memory_space<vmem>>, vector<32x768xbf16>
      %c0_120 = arith.constant 0 : index
      %c0_121 = arith.constant 0 : index
      %183 = vector.load %arg3[%c0_120, %c0_121] : memref<768x32xbf16, #tpu.memory_space<vmem>>, vector<768x32xbf16>
      %cst_122 = arith.constant dense<0.000000e+00> : vector<32x32xf32>
      %184 = tpu.matmul %182, %183, %cst_122 {dimension_numbers = #tpu.dot_dimension_numbers<[1], [0], [0], [1], [0, 0, 1, 1], [], []>} : vector<32x768xbf16>, vector<768x32xbf16>, vector<32x32xf32> -> vector<32x32xf32>
      %c0_123 = arith.constant 0 : index
      %c0_124 = arith.constant 0 : index
      %185 = vector.load %arg4[%c0_123, %c0_124] : memref<1x32xf32, #tpu.memory_space<vmem>>, vector<1x32xf32>
      %186 = vector.broadcast %185 : vector<1x32xf32> to vector<32x32xf32>
      %187 = arith.addf %184, %186 : vector<32x32xf32>
      %c0_125 = arith.constant 0 : index
      %c0_126 = arith.constant 0 : index
      %188 = vector.load %arg5[%c0_125, %c0_126] : memref<1x32xf32, #tpu.memory_space<vmem>>, vector<1x32xf32>
      %c0_127 = arith.constant 0 : index
      %c0_128 = arith.constant 0 : index
      %189 = vector.load %arg6[%c0_127, %c0_128] : memref<1x32xf32, #tpu.memory_space<vmem>>, vector<1x32xf32>
      %cst_129 = arith.constant dense<0.000000e+00> : vector<32xf32>
      %190 = vector.multi_reduction <add>, %187, %cst_129 [1] : vector<32x32xf32> to vector<32xf32>
      %191 = vector.shape_cast %190 : vector<32xf32> to vector<32x1xf32>
      %cst_130 = arith.constant 3.200000e+01 : f32
      %192 = vector.broadcast %cst_130 : f32 to vector<32x1xf32>
      %193 = arith.divf %191, %192 : vector<32x1xf32>
      %194 = vector.broadcast %193 : vector<32x1xf32> to vector<32x32xf32>
      %195 = arith.subf %187, %194 : vector<32x32xf32>
      %196 = arith.mulf %195, %195 : vector<32x32xf32>
      %cst_131 = arith.constant dense<0.000000e+00> : vector<32xf32>
      %197 = vector.multi_reduction <add>, %196, %cst_131 [1] : vector<32x32xf32> to vector<32xf32>
      %198 = vector.shape_cast %197 : vector<32xf32> to vector<32x1xf32>
      %cst_132 = arith.constant 3.200000e+01 : f32
      %199 = vector.broadcast %cst_132 : f32 to vector<32x1xf32>
      %200 = arith.divf %198, %199 : vector<32x1xf32>
      %201 = vector.broadcast %193 : vector<32x1xf32> to vector<32x32xf32>
      %202 = arith.subf %187, %201 : vector<32x32xf32>
      %cst_133 = arith.constant 9.99999997E-7 : f32
      %203 = vector.broadcast %cst_133 : f32 to vector<32x1xf32>
      %204 = arith.addf %200, %203 : vector<32x1xf32>
      %205 = math.rsqrt %204 : vector<32x1xf32>
      %206 = vector.broadcast %205 : vector<32x1xf32> to vector<32x32xf32>
      %207 = arith.mulf %202, %206 : vector<32x32xf32>
      %208 = vector.broadcast %188 : vector<1x32xf32> to vector<32x32xf32>
      %209 = arith.mulf %207, %208 : vector<32x32xf32>
      %210 = vector.broadcast %189 : vector<1x32xf32> to vector<32x32xf32>
      %211 = arith.addf %209, %210 : vector<32x32xf32>
      %c0_134 = arith.constant 0 : index
      %c0_135 = arith.constant 0 : index
      %212 = vector.load %arg24[%c0_134, %c0_135] : memref<32x32xf32, #tpu.memory_space<vmem>>, vector<32x32xf32>
      tpu.vector_store %arg24[%c0_134, %c0_135], %211 {strides = array<i32>} : memref<32x32xf32, #tpu.memory_space<vmem>>, vector<32x32xf32>,
    } else {
    }
    %c0 = arith.constant 0 : index
    %c0_1 = arith.constant 0 : index
    %3 = vector.load %arg24[%c0, %c0_1] : memref<32x32xf32, #tpu.memory_space<vmem>>, vector<32x32xf32>
    %4 = arith.truncf %3 : vector<32x32xf32> to vector<32x32xbf16>
    %cst = arith.constant 0.000000e+00 : f32
    %5 = vector.broadcast %cst : f32 to vector<32x32xf32>
    %c0_2 = arith.constant 0 : index
    %c0_3 = arith.constant 0 : index
    %c0_4 = arith.constant 0 : index
    %c0_5 = arith.constant 0 : index
    %6 = vector.load %arg7[%c0_2, %c0_3, %c0_4, %c0_5] : memref<1x2x32x16xbf16, #tpu.memory_space<vmem>>, vector<1x1x32x16xbf16>
    %7 = vector.shape_cast %6 : vector<1x1x32x16xbf16> to vector<32x16xbf16>
    %cst_6 = arith.constant dense<0.000000e+00> : vector<32x16xf32>
    %8 = tpu.matmul %4, %7, %cst_6 {dimension_numbers = #tpu.dot_dimension_numbers<[1], [0], [0], [1], [0, 0, 1, 1], [], []>} : vector<32x32xbf16>, vector<32x16xbf16>, vector<32x16xf32> -> vector<32x16xf32>
    %c0_7 = arith.constant 0 : index
    %c0_8 = arith.constant 0 : index
    %c0_9 = arith.constant 0 : index
    %c0_10 = arith.constant 0 : index
    %9 = vector.load %arg8[%c0_7, %c0_8, %c0_9, %c0_10] : memref<1x2x1x16xf32, #tpu.memory_space<vmem>>, vector<1x1x1x16xf32>
    %10 = vector.shape_cast %9 : vector<1x1x1x16xf32> to vector<1x16xf32>
    %11 = vector.broadcast %10 : vector<1x16xf32> to vector<32x16xf32>
    %12 = arith.addf %8, %11 : vector<32x16xf32>
    %c0_11 = arith.constant 0 : index
    %c0_12 = arith.constant 0 : index
    %c0_13 = arith.constant 0 : index
    %c0_14 = arith.constant 0 : index
    %13 = vector.load %arg9[%c0_11, %c0_12, %c0_13, %c0_14] : memref<1x2x32x16xbf16, #tpu.memory_space<vmem>>, vector<1x1x32x16xbf16>
    %14 = vector.shape_cast %13 : vector<1x1x32x16xbf16> to vector<32x16xbf16>
    %cst_15 = arith.constant dense<0.000000e+00> : vector<32x16xf32>
    %15 = tpu.matmul %4, %14, %cst_15 {dimension_numbers = #tpu.dot_dimension_numbers<[1], [0], [0], [1], [0, 0, 1, 1], [], []>} : vector<32x32xbf16>, vector<32x16xbf16>, vector<32x16xf32> -> vector<32x16xf32>
    %c0_16 = arith.constant 0 : index
    %c0_17 = arith.constant 0 : index
    %c0_18 = arith.constant 0 : index
    %c0_19 = arith.constant 0 : index
    %16 = vector.load %arg10[%c0_16, %c0_17, %c0_18, %c0_19] : memref<1x2x1x16xf32, #tpu.memory_space<vmem>>, vector<1x1x1x16xf32>
    %17 = vector.shape_cast %16 : vector<1x1x1x16xf32> to vector<1x16xf32>
    %18 = vector.broadcast %17 : vector<1x16xf32> to vector<32x16xf32>
    %19 = arith.addf %15, %18 : vector<32x16xf32>
    %c0_20 = arith.constant 0 : index
    %c0_21 = arith.constant 0 : index
    %c0_22 = arith.constant 0 : index
    %c0_23 = arith.constant 0 : index
    %20 = vector.load %arg11[%c0_20, %c0_21, %c0_22, %c0_23] : memref<1x2x32x16xbf16, #tpu.memory_space<vmem>>, vector<1x1x32x16xbf16>
    %21 = vector.shape_cast %20 : vector<1x1x32x16xbf16> to vector<32x16xbf16>
    %cst_24 = arith.constant dense<0.000000e+00> : vector<32x16xf32>
    %22 = tpu.matmul %4, %21, %cst_24 {dimension_numbers = #tpu.dot_dimension_numbers<[1], [0], [0], [1], [0, 0, 1, 1], [], []>} : vector<32x32xbf16>, vector<32x16xbf16>, vector<32x16xf32> -> vector<32x16xf32>
    %c0_25 = arith.constant 0 : index
    %c0_26 = arith.constant 0 : index
    %c0_27 = arith.constant 0 : index
    %c0_28 = arith.constant 0 : index
    %23 = vector.load %arg12[%c0_25, %c0_26, %c0_27, %c0_28] : memref<1x2x1x16xf32, #tpu.memory_space<vmem>>, vector<1x1x1x16xf32>
    %24 = vector.shape_cast %23 : vector<1x1x1x16xf32> to vector<1x16xf32>
    %25 = vector.broadcast %24 : vector<1x16xf32> to vector<32x16xf32>
    %26 = arith.addf %22, %25 : vector<32x16xf32>
    %cst_29 = arith.constant 2.500000e-01 : f32
    %27 = vector.broadcast %cst_29 : f32 to vector<32x16xf32>
    %28 = arith.mulf %12, %27 : vector<32x16xf32>
    %29 = vector.shape_cast %28 : vector<32x16xf32> to vector<2x16x16xf32>
    %30 = arith.truncf %29 : vector<2x16x16xf32> to vector<2x16x16xbf16>
    %31 = vector.shape_cast %19 : vector<32x16xf32> to vector<2x16x16xf32>
    %32 = arith.truncf %31 : vector<2x16x16xf32> to vector<2x16x16xbf16>
    %33 = vector.shape_cast %26 : vector<32x16xf32> to vector<2x16x16xf32>
    %34 = arith.truncf %33 : vector<2x16x16xf32> to vector<2x16x16xbf16>
    "tpu.trace_start"() <{level = 10 : i32, message = "bqc,bkc->bqk"}> : () -> ()
    %cst_30 = arith.constant dense<0.000000e+00> : vector<2x16x16xf32>
    %35 = tpu.matmul %30, %32, %cst_30 {dimension_numbers = #tpu.dot_dimension_numbers<[2], [2], [1], [1], [0, 0, 0, 1, 1, 1], [0], [0]>} : vector<2x16x16xbf16>, vector<2x16x16xbf16>, vector<2x16x16xf32> -> vector<2x16x16xf32>
    "tpu.trace_stop"() : () -> ()
    %cst_31 = arith.constant dense<0xFF800000> : vector<2x16xf32>
    %36 = vector.multi_reduction <maximumf>, %35, %cst_31 [2] : vector<2x16x16xf32> to vector<2x16xf32>
    %37 = vector.shape_cast %36 : vector<2x16xf32> to vector<2x16x1xf32>
    %38 = vector.broadcast %37 : vector<2x16x1xf32> to vector<2x16x16xf32>
    %39 = arith.subf %35, %38 : vector<2x16x16xf32>
    %40 = math.exp %39 : vector<2x16x16xf32>
    %cst_32 = arith.constant dense<0.000000e+00> : vector<2x16xf32>
    %41 = vector.multi_reduction <add>, %40, %cst_32 [2] : vector<2x16x16xf32> to vector<2x16xf32>
    %42 = vector.shape_cast %41 : vector<2x16xf32> to vector<2x16x1xf32>
    %43 = tpu.reciprocal %42 {approx = true} : vector<2x16x1xf32> -> vector<2x16x1xf32>
    %44 = vector.broadcast %43 : vector<2x16x1xf32> to vector<2x16x16xf32>
    %45 = arith.mulf %40, %44 : vector<2x16x16xf32>
    %46 = arith.truncf %45 : vector<2x16x16xf32> to vector<2x16x16xbf16>
    "tpu.trace_start"() <{level = 10 : i32, message = "bqk,bkd->bqd"}> : () -> ()
    %cst_33 = arith.constant dense<0.000000e+00> : vector<2x16x16xf32>
    %47 = tpu.matmul %46, %34, %cst_33 {dimension_numbers = #tpu.dot_dimension_numbers<[2], [1], [1], [2], [0, 0, 0, 1, 1, 2], [0], [0]>} : vector<2x16x16xbf16>, vector<2x16x16xbf16>, vector<2x16x16xf32> -> vector<2x16x16xf32>
    "tpu.trace_stop"() : () -> ()
    %48 = vector.shape_cast %47 : vector<2x16x16xf32> to vector<32x16xf32>
    %49 = arith.truncf %48 : vector<32x16xf32> to vector<32x16xbf16>
    %c0_34 = arith.constant 0 : index
    %c0_35 = arith.constant 0 : index
    %c0_36 = arith.constant 0 : index
    %c0_37 = arith.constant 0 : index
    %50 = vector.load %arg13[%c0_34, %c0_35, %c0_36, %c0_37] : memref<1x2x16x32xbf16, #tpu.memory_space<vmem>>, vector<1x1x16x32xbf16>
    %51 = vector.shape_cast %50 : vector<1x1x16x32xbf16> to vector<16x32xbf16>
    %cst_38 = arith.constant dense<0.000000e+00> : vector<32x32xf32>
    %52 = tpu.matmul %49, %51, %cst_38 {dimension_numbers = #tpu.dot_dimension_numbers<[1], [0], [0], [1], [0, 0, 1, 1], [], []>} : vector<32x16xbf16>, vector<16x32xbf16>, vector<32x32xf32> -> vector<32x32xf32>
    %53 = arith.addf %5, %52 : vector<32x32xf32>
    %c0_39 = arith.constant 0 : index
    %c1 = arith.constant 1 : index
    %c0_40 = arith.constant 0 : index
    %c0_41 = arith.constant 0 : index
    %54 = vector.load %arg7[%c0_39, %c1, %c0_40, %c0_41] : memref<1x2x32x16xbf16, #tpu.memory_space<vmem>>, vector<1x1x32x16xbf16>
    %55 = vector.shape_cast %54 : vector<1x1x32x16xbf16> to vector<32x16xbf16>
    %cst_42 = arith.constant dense<0.000000e+00> : vector<32x16xf32>
    %56 = tpu.matmul %4, %55, %cst_42 {dimension_numbers = #tpu.dot_dimension_numbers<[1], [0], [0], [1], [0, 0, 1, 1], [], []>} : vector<32x32xbf16>, vector<32x16xbf16>, vector<32x16xf32> -> vector<32x16xf32>
    %c0_43 = arith.constant 0 : index
    %c1_44 = arith.constant 1 : index
    %c0_45 = arith.constant 0 : index
    %c0_46 = arith.constant 0 : index
    %57 = vector.load %arg8[%c0_43, %c1_44, %c0_45, %c0_46] : memref<1x2x1x16xf32, #tpu.memory_space<vmem>>, vector<1x1x1x16xf32>
    %58 = vector.shape_cast %57 : vector<1x1x1x16xf32> to vector<1x16xf32>
    %59 = vector.broadcast %58 : vector<1x16xf32> to vector<32x16xf32>
    %60 = arith.addf %56, %59 : vector<32x16xf32>
    %c0_47 = arith.constant 0 : index
    %c1_48 = arith.constant 1 : index
    %c0_49 = arith.constant 0 : index
    %c0_50 = arith.constant 0 : index
    %61 = vector.load %arg9[%c0_47, %c1_48, %c0_49, %c0_50] : memref<1x2x32x16xbf16, #tpu.memory_space<vmem>>, vector<1x1x32x16xbf16>
    %62 = vector.shape_cast %61 : vector<1x1x32x16xbf16> to vector<32x16xbf16>
    %cst_51 = arith.constant dense<0.000000e+00> : vector<32x16xf32>
    %63 = tpu.matmul %4, %62, %cst_51 {dimension_numbers = #tpu.dot_dimension_numbers<[1], [0], [0], [1], [0, 0, 1, 1], [], []>} : vector<32x32xbf16>, vector<32x16xbf16>, vector<32x16xf32> -> vector<32x16xf32>
    %c0_52 = arith.constant 0 : index
    %c1_53 = arith.constant 1 : index
    %c0_54 = arith.constant 0 : index
    %c0_55 = arith.constant 0 : index
    %64 = vector.load %arg10[%c0_52, %c1_53, %c0_54, %c0_55] : memref<1x2x1x16xf32, #tpu.memory_space<vmem>>, vector<1x1x1x16xf32>
    %65 = vector.shape_cast %64 : vector<1x1x1x16xf32> to vector<1x16xf32>
    %66 = vector.broadcast %65 : vector<1x16xf32> to vector<32x16xf32>
    %67 = arith.addf %63, %66 : vector<32x16xf32>
    %c0_56 = arith.constant 0 : index
    %c1_57 = arith.constant 1 : index
    %c0_58 = arith.constant 0 : index
    %c0_59 = arith.constant 0 : index
    %68 = vector.load %arg11[%c0_56, %c1_57, %c0_58, %c0_59] : memref<1x2x32x16xbf16, #tpu.memory_space<vmem>>, vector<1x1x32x16xbf16>
    %69 = vector.shape_cast %68 : vector<1x1x32x16xbf16> to vector<32x16xbf16>
    %cst_60 = arith.constant dense<0.000000e+00> : vector<32x16xf32>
    %70 = tpu.matmul %4, %69, %cst_60 {dimension_numbers = #tpu.dot_dimension_numbers<[1], [0], [0], [1], [0, 0, 1, 1], [], []>} : vector<32x32xbf16>, vector<32x16xbf16>, vector<32x16xf32> -> vector<32x16xf32>
    %c0_61 = arith.constant 0 : index
    %c1_62 = arith.constant 1 : index
    %c0_63 = arith.constant 0 : index
    %c0_64 = arith.constant 0 : index
    %71 = vector.load %arg12[%c0_61, %c1_62, %c0_63, %c0_64] : memref<1x2x1x16xf32, #tpu.memory_space<vmem>>, vector<1x1x1x16xf32>
    %72 = vector.shape_cast %71 : vector<1x1x1x16xf32> to vector<1x16xf32>
    %73 = vector.broadcast %72 : vector<1x16xf32> to vector<32x16xf32>
    %74 = arith.addf %70, %73 : vector<32x16xf32>
    %cst_65 = arith.constant 2.500000e-01 : f32
    %75 = vector.broadcast %cst_65 : f32 to vector<32x16xf32>
    %76 = arith.mulf %60, %75 : vector<32x16xf32>
    %77 = vector.shape_cast %76 : vector<32x16xf32> to vector<2x16x16xf32>
    %78 = arith.truncf %77 : vector<2x16x16xf32> to vector<2x16x16xbf16>
    %79 = vector.shape_cast %67 : vector<32x16xf32> to vector<2x16x16xf32>
    %80 = arith.truncf %79 : vector<2x16x16xf32> to vector<2x16x16xbf16>
    %81 = vector.shape_cast %74 : vector<32x16xf32> to vector<2x16x16xf32>
    %82 = arith.truncf %81 : vector<2x16x16xf32> to vector<2x16x16xbf16>
    "tpu.trace_start"() <{level = 10 : i32, message = "bqc,bkc->bqk"}> : () -> ()
    %cst_66 = arith.constant dense<0.000000e+00> : vector<2x16x16xf32>
    %83 = tpu.matmul %78, %80, %cst_66 {dimension_numbers = #tpu.dot_dimension_numbers<[2], [2], [1], [1], [0, 0, 0, 1, 1, 1], [0], [0]>} : vector<2x16x16xbf16>, vector<2x16x16xbf16>, vector<2x16x16xf32> -> vector<2x16x16xf32>
    "tpu.trace_stop"() : () -> ()
    %cst_67 = arith.constant dense<0xFF800000> : vector<2x16xf32>
    %84 = vector.multi_reduction <maximumf>, %83, %cst_67 [2] : vector<2x16x16xf32> to vector<2x16xf32>
    %85 = vector.shape_cast %84 : vector<2x16xf32> to vector<2x16x1xf32>
    %86 = vector.broadcast %85 : vector<2x16x1xf32> to vector<2x16x16xf32>
    %87 = arith.subf %83, %86 : vector<2x16x16xf32>
    %88 = math.exp %87 : vector<2x16x16xf32>
    %cst_68 = arith.constant dense<0.000000e+00> : vector<2x16xf32>
    %89 = vector.multi_reduction <add>, %88, %cst_68 [2] : vector<2x16x16xf32> to vector<2x16xf32>
    %90 = vector.shape_cast %89 : vector<2x16xf32> to vector<2x16x1xf32>
    %91 = tpu.reciprocal %90 {approx = true} : vector<2x16x1xf32> -> vector<2x16x1xf32>
    %92 = vector.broadcast %91 : vector<2x16x1xf32> to vector<2x16x16xf32>
    %93 = arith.mulf %88, %92 : vector<2x16x16xf32>
    %94 = arith.truncf %93 : vector<2x16x16xf32> to vector<2x16x16xbf16>
    "tpu.trace_start"() <{level = 10 : i32, message = "bqk,bkd->bqd"}> : () -> ()
    %cst_69 = arith.constant dense<0.000000e+00> : vector<2x16x16xf32>
    %95 = tpu.matmul %94, %82, %cst_69 {dimension_numbers = #tpu.dot_dimension_numbers<[2], [1], [1], [2], [0, 0, 0, 1, 1, 2], [0], [0]>} : vector<2x16x16xbf16>, vector<2x16x16xbf16>, vector<2x16x16xf32> -> vector<2x16x16xf32>
    "tpu.trace_stop"() : () -> ()
    %96 = vector.shape_cast %95 : vector<2x16x16xf32> to vector<32x16xf32>
    %97 = arith.truncf %96 : vector<32x16xf32> to vector<32x16xbf16>
    %c0_70 = arith.constant 0 : index
    %c1_71 = arith.constant 1 : index
    %c0_72 = arith.constant 0 : index
    %c0_73 = arith.constant 0 : index
    %98 = vector.load %arg13[%c0_70, %c1_71, %c0_72, %c0_73] : memref<1x2x16x32xbf16, #tpu.memory_space<vmem>>, vector<1x1x16x32xbf16>
    %99 = vector.shape_cast %98 : vector<1x1x16x32xbf16> to vector<16x32xbf16>
    %cst_74 = arith.constant dense<0.000000e+00> : vector<32x32xf32>
    %100 = tpu.matmul %97, %99, %cst_74 {dimension_numbers = #tpu.dot_dimension_numbers<[1], [0], [0], [1], [0, 0, 1, 1], [], []>} : vector<32x16xbf16>, vector<16x32xbf16>, vector<32x32xf32> -> vector<32x32xf32>
    %101 = arith.addf %53, %100 : vector<32x32xf32>
    %c0_75 = arith.constant 0 : index
    %c0_76 = arith.constant 0 : index
    %c0_77 = arith.constant 0 : index
    %102 = vector.load %arg14[%c0_75, %c0_76, %c0_77] : memref<1x1x32xf32, #tpu.memory_space<vmem>>, vector<1x1x32xf32>
    %103 = vector.shape_cast %102 : vector<1x1x32xf32> to vector<1x32xf32>
    %104 = vector.broadcast %103 : vector<1x32xf32> to vector<32x32xf32>
    %105 = arith.addf %101, %104 : vector<32x32xf32>
    %106 = arith.addf %105, %3 : vector<32x32xf32>
    %c0_78 = arith.constant 0 : index
    %c0_79 = arith.constant 0 : index
    %c0_80 = arith.constant 0 : index
    %107 = vector.load %arg15[%c0_78, %c0_79, %c0_80] : memref<1x1x32xf32, #tpu.memory_space<vmem>>, vector<1x1x32xf32>
    %108 = vector.shape_cast %107 : vector<1x1x32xf32> to vector<1x32xf32>
    %c0_81 = arith.constant 0 : index
    %c0_82 = arith.constant 0 : index
    %c0_83 = arith.constant 0 : index
    %109 = vector.load %arg16[%c0_81, %c0_82, %c0_83] : memref<1x1x32xf32, #tpu.memory_space<vmem>>, vector<1x1x32xf32>
    %110 = vector.shape_cast %109 : vector<1x1x32xf32> to vector<1x32xf32>
    %cst_84 = arith.constant dense<0.000000e+00> : vector<32xf32>
    %111 = vector.multi_reduction <add>, %106, %cst_84 [1] : vector<32x32xf32> to vector<32xf32>
    %112 = vector.shape_cast %111 : vector<32xf32> to vector<32x1xf32>
    %cst_85 = arith.constant 3.200000e+01 : f32
    %113 = vector.broadcast %cst_85 : f32 to vector<32x1xf32>
    %114 = arith.divf %112, %113 : vector<32x1xf32>
    %115 = vector.broadcast %114 : vector<32x1xf32> to vector<32x32xf32>
    %116 = arith.subf %106, %115 : vector<32x32xf32>
    %117 = arith.mulf %116, %116 : vector<32x32xf32>
    %cst_86 = arith.constant dense<0.000000e+00> : vector<32xf32>
    %118 = vector.multi_reduction <add>, %117, %cst_86 [1] : vector<32x32xf32> to vector<32xf32>
    %119 = vector.shape_cast %118 : vector<32xf32> to vector<32x1xf32>
    %cst_87 = arith.constant 3.200000e+01 : f32
    %120 = vector.broadcast %cst_87 : f32 to vector<32x1xf32>
    %121 = arith.divf %119, %120 : vector<32x1xf32>
    %122 = vector.broadcast %114 : vector<32x1xf32> to vector<32x32xf32>
    %123 = arith.subf %106, %122 : vector<32x32xf32>
    %cst_88 = arith.constant 9.99999997E-7 : f32
    %124 = vector.broadcast %cst_88 : f32 to vector<32x1xf32>
    %125 = arith.addf %121, %124 : vector<32x1xf32>
    %126 = math.rsqrt %125 : vector<32x1xf32>
    %127 = vector.broadcast %126 : vector<32x1xf32> to vector<32x32xf32>
    %128 = arith.mulf %123, %127 : vector<32x32xf32>
    %129 = vector.broadcast %108 : vector<1x32xf32> to vector<32x32xf32>
    %130 = arith.mulf %128, %129 : vector<32x32xf32>
    %131 = vector.broadcast %110 : vector<1x32xf32> to vector<32x32xf32>
    %132 = arith.addf %130, %131 : vector<32x32xf32>
    %133 = arith.truncf %132 : vector<32x32xf32> to vector<32x32xbf16>
    %c0_89 = arith.constant 0 : index
    %c0_90 = arith.constant 0 : index
    %c0_91 = arith.constant 0 : index
    %134 = vector.load %arg17[%c0_89, %c0_90, %c0_91] : memref<1x32x64xbf16, #tpu.memory_space<vmem>>, vector<1x32x64xbf16>
    %135 = vector.shape_cast %134 : vector<1x32x64xbf16> to vector<32x64xbf16>
    %cst_92 = arith.constant dense<0.000000e+00> : vector<32x64xf32>
    %136 = tpu.matmul %133, %135, %cst_92 {dimension_numbers = #tpu.dot_dimension_numbers<[1], [0], [0], [1], [0, 0, 1, 1], [], []>} : vector<32x32xbf16>, vector<32x64xbf16>, vector<32x64xf32> -> vector<32x64xf32>
    %c0_93 = arith.constant 0 : index
    %c0_94 = arith.constant 0 : index
    %c0_95 = arith.constant 0 : index
    %137 = vector.load %arg18[%c0_93, %c0_94, %c0_95] : memref<1x1x64xf32, #tpu.memory_space<vmem>>, vector<1x1x64xf32>
    %138 = vector.shape_cast %137 : vector<1x1x64xf32> to vector<1x64xf32>
    %139 = vector.broadcast %138 : vector<1x64xf32> to vector<32x64xf32>
    %140 = arith.addf %136, %139 : vector<32x64xf32>
    %cst_96 = arith.constant 0.000000e+00 : f32
    %141 = vector.broadcast %cst_96 : f32 to vector<32x64xf32>
    %142 = arith.maximumf %140, %141 : vector<32x64xf32>
    %143 = arith.truncf %142 : vector<32x64xf32> to vector<32x64xbf16>
    %c0_97 = arith.constant 0 : index
    %c0_98 = arith.constant 0 : index
    %c0_99 = arith.constant 0 : index
    %144 = vector.load %arg19[%c0_97, %c0_98, %c0_99] : memref<1x64x32xbf16, #tpu.memory_space<vmem>>, vector<1x64x32xbf16>
    %145 = vector.shape_cast %144 : vector<1x64x32xbf16> to vector<64x32xbf16>
    %cst_100 = arith.constant dense<0.000000e+00> : vector<32x32xf32>
    %146 = tpu.matmul %143, %145, %cst_100 {dimension_numbers = #tpu.dot_dimension_numbers<[1], [0], [0], [1], [0, 0, 1, 1], [], []>} : vector<32x64xbf16>, vector<64x32xbf16>, vector<32x32xf32> -> vector<32x32xf32>
    %c0_101 = arith.constant 0 : index
    %c0_102 = arith.constant 0 : index
    %c0_103 = arith.constant 0 : index
    %147 = vector.load %arg20[%c0_101, %c0_102, %c0_103] : memref<1x1x32xf32, #tpu.memory_space<vmem>>, vector<1x1x32xf32>
    %148 = vector.shape_cast %147 : vector<1x1x32xf32> to vector<1x32xf32>
    %149 = vector.broadcast %148 : vector<1x32xf32> to vector<32x32xf32>
    %150 = arith.addf %146, %149 : vector<32x32xf32>
    %151 = arith.addf %150, %132 : vector<32x32xf32>
    %c0_104 = arith.constant 0 : index
    %c0_105 = arith.constant 0 : index
    %c0_106 = arith.constant 0 : index
    %152 = vector.load %arg21[%c0_104, %c0_105, %c0_106] : memref<1x1x32xf32, #tpu.memory_space<vmem>>, vector<1x1x32xf32>
    %153 = vector.shape_cast %152 : vector<1x1x32xf32> to vector<1x32xf32>
    %c0_107 = arith.constant 0 : index
    %c0_108 = arith.constant 0 : index
    %c0_109 = arith.constant 0 : index
    %154 = vector.load %arg22[%c0_107, %c0_108, %c0_109] : memref<1x1x32xf32, #tpu.memory_space<vmem>>, vector<1x1x32xf32>
    %155 = vector.shape_cast %154 : vector<1x1x32xf32> to vector<1x32xf32>
    %cst_110 = arith.constant dense<0.000000e+00> : vector<32xf32>
    %156 = vector.multi_reduction <add>, %151, %cst_110 [1] : vector<32x32xf32> to vector<32xf32>
    %157 = vector.shape_cast %156 : vector<32xf32> to vector<32x1xf32>
    %cst_111 = arith.constant 3.200000e+01 : f32
    %158 = vector.broadcast %cst_111 : f32 to vector<32x1xf32>
    %159 = arith.divf %157, %158 : vector<32x1xf32>
    %160 = vector.broadcast %159 : vector<32x1xf32> to vector<32x32xf32>
    %161 = arith.subf %151, %160 : vector<32x32xf32>
    %162 = arith.mulf %161, %161 : vector<32x32xf32>
    %cst_112 = arith.constant dense<0.000000e+00> : vector<32xf32>
    %163 = vector.multi_reduction <add>, %162, %cst_112 [1] : vector<32x32xf32> to vector<32xf32>
    %164 = vector.shape_cast %163 : vector<32xf32> to vector<32x1xf32>
    %cst_113 = arith.constant 3.200000e+01 : f32
    %165 = vector.broadcast %cst_113 : f32 to vector<32x1xf32>
    %166 = arith.divf %164, %165 : vector<32x1xf32>
    %167 = vector.broadcast %159 : vector<32x1xf32> to vector<32x32xf32>
    %168 = arith.subf %151, %167 : vector<32x32xf32>
    %cst_114 = arith.constant 9.99999997E-7 : f32
    %169 = vector.broadcast %cst_114 : f32 to vector<32x1xf32>
    %170 = arith.addf %166, %169 : vector<32x1xf32>
    %171 = math.rsqrt %170 : vector<32x1xf32>
    %172 = vector.broadcast %171 : vector<32x1xf32> to vector<32x32xf32>
    %173 = arith.mulf %168, %172 : vector<32x32xf32>
    %174 = vector.broadcast %153 : vector<1x32xf32> to vector<32x32xf32>
    %175 = arith.mulf %173, %174 : vector<32x32xf32>
    %176 = vector.broadcast %155 : vector<1x32xf32> to vector<32x32xf32>
    %177 = arith.addf %175, %176 : vector<32x32xf32>
    %c0_115 = arith.constant 0 : index
    %c0_116 = arith.constant 0 : index
    %178 = vector.load %arg24[%c0_115, %c0_116] : memref<32x32xf32, #tpu.memory_space<vmem>>, vector<32x32xf32>
    tpu.vector_store %arg24[%c0_115, %c0_116], %177 {strides = array<i32>} : memref<32x32xf32, #tpu.memory_space<vmem>>, vector<32x32xf32>,
    %c1_i32 = arith.constant 1 : i32
    %179 = arith.cmpi eq, %arg1, %c1_i32 : i32
    %180 = arith.extui %179 : i1 to i32
    %c0_i32_117 = arith.constant 0 : i32
    %181 = arith.cmpi ne, %180, %c0_i32_117 : i32
    scf.if %181 {
      %c0_118 = arith.constant 0 : index
      %c0_119 = arith.constant 0 : index
      %182 = vector.load %arg23[%c0_118, %c0_119] : memref<32x32xf32, #tpu.memory_space<vmem>>, vector<32x32xf32>
      tpu.vector_store %arg23[%c0_118, %c0_119], %177 {strides = array<i32>} : memref<32x32xf32, #tpu.memory_space<vmem>>, vector<32x32xf32>,
    } else {
    }
    return
  }
  func.func @transform_0(%arg0: i32, %arg1: i32) -> (i32, i32) {
    %c0_i32 = arith.constant 0 : i32
    %c0_i32_0 = arith.constant 0 : i32
    return %arg0, %c0_i32 : i32, i32
  }
  func.func @transform_1(%arg0: i32, %arg1: i32) -> (i32, i32) {
    %c0_i32 = arith.constant 0 : i32
    %c0_i32_0 = arith.constant 0 : i32
    %c0_i32_1 = arith.constant 0 : i32
    return %c0_i32, %c0_i32_0 : i32, i32
  }
  func.func @transform_2(%arg0: i32, %arg1: i32) -> (i32, i32) {
    %c0_i32 = arith.constant 0 : i32
    %c0_i32_0 = arith.constant 0 : i32
    %c0_i32_1 = arith.constant 0 : i32
    return %c0_i32, %c0_i32_0 : i32, i32
  }
  func.func @transform_3(%arg0: i32, %arg1: i32) -> (i32, i32) {
    %c0_i32 = arith.constant 0 : i32
    %c0_i32_0 = arith.constant 0 : i32
    %c0_i32_1 = arith.constant 0 : i32
    return %c0_i32, %c0_i32_0 : i32, i32
  }
  func.func @transform_4(%arg0: i32, %arg1: i32) -> (i32, i32) {
    %c0_i32 = arith.constant 0 : i32
    %c0_i32_0 = arith.constant 0 : i32
    %c0_i32_1 = arith.constant 0 : i32
    return %c0_i32, %c0_i32_0 : i32, i32
  }
  func.func @transform_5(%arg0: i32, %arg1: i32) -> (i32, i32, i32, i32) {
    %c0_i32 = arith.constant 0 : i32
    %c0_i32_0 = arith.constant 0 : i32
    %c0_i32_1 = arith.constant 0 : i32
    %c0_i32_2 = arith.constant 0 : i32
    return %arg1, %c0_i32, %c0_i32_0, %c0_i32_1 : i32, i32, i32, i32
  }
  func.func @transform_6(%arg0: i32, %arg1: i32) -> (i32, i32, i32, i32) {
    %c0_i32 = arith.constant 0 : i32
    %c0_i32_0 = arith.constant 0 : i32
    %c0_i32_1 = arith.constant 0 : i32
    %c0_i32_2 = arith.constant 0 : i32
    return %arg1, %c0_i32, %c0_i32_0, %c0_i32_1 : i32, i32, i32, i32
  }
  func.func @transform_7(%arg0: i32, %arg1: i32) -> (i32, i32, i32, i32) {
    %c0_i32 = arith.constant 0 : i32
    %c0_i32_0 = arith.constant 0 : i32
    %c0_i32_1 = arith.constant 0 : i32
    %c0_i32_2 = arith.constant 0 : i32
    return %arg1, %c0_i32, %c0_i32_0, %c0_i32_1 : i32, i32, i32, i32
  }
  func.func @transform_8(%arg0: i32, %arg1: i32) -> (i32, i32, i32, i32) {
    %c0_i32 = arith.constant 0 : i32
    %c0_i32_0 = arith.constant 0 : i32
    %c0_i32_1 = arith.constant 0 : i32
    %c0_i32_2 = arith.constant 0 : i32
    return %arg1, %c0_i32, %c0_i32_0, %c0_i32_1 : i32, i32, i32, i32
  }
  func.func @transform_9(%arg0: i32, %arg1: i32) -> (i32, i32, i32, i32) {
    %c0_i32 = arith.constant 0 : i32
    %c0_i32_0 = arith.constant 0 : i32
    %c0_i32_1 = arith.constant 0 : i32
    %c0_i32_2 = arith.constant 0 : i32
    return %arg1, %c0_i32, %c0_i32_0, %c0_i32_1 : i32, i32, i32, i32
  }
  func.func @transform_10(%arg0: i32, %arg1: i32) -> (i32, i32, i32, i32) {
    %c0_i32 = arith.constant 0 : i32
    %c0_i32_0 = arith.constant 0 : i32
    %c0_i32_1 = arith.constant 0 : i32
    %c0_i32_2 = arith.constant 0 : i32
    return %arg1, %c0_i32, %c0_i32_0, %c0_i32_1 : i32, i32, i32, i32
  }
  func.func @transform_11(%arg0: i32, %arg1: i32) -> (i32, i32, i32, i32) {
    %c0_i32 = arith.constant 0 : i32
    %c0_i32_0 = arith.constant 0 : i32
    %c0_i32_1 = arith.constant 0 : i32
    %c0_i32_2 = arith.constant 0 : i32
    return %arg1, %c0_i32, %c0_i32_0, %c0_i32_1 : i32, i32, i32, i32
  }
  func.func @transform_12(%arg0: i32, %arg1: i32) -> (i32, i32, i32) {
    %c0_i32 = arith.constant 0 : i32
    %c0_i32_0 = arith.constant 0 : i32
    %c0_i32_1 = arith.constant 0 : i32
    return %arg1, %c0_i32, %c0_i32_0 : i32, i32, i32
  }
  func.func @transform_13(%arg0: i32, %arg1: i32) -> (i32, i32, i32) {
    %c0_i32 = arith.constant 0 : i32
    %c0_i32_0 = arith.constant 0 : i32
    %c0_i32_1 = arith.constant 0 : i32
    return %arg1, %c0_i32, %c0_i32_0 : i32, i32, i32
  }
  func.func @transform_14(%arg0: i32, %arg1: i32) -> (i32, i32, i32) {
    %c0_i32 = arith.constant 0 : i32
    %c0_i32_0 = arith.constant 0 : i32
    %c0_i32_1 = arith.constant 0 : i32
    return %arg1, %c0_i32, %c0_i32_0 : i32, i32, i32
  }
  func.func @transform_15(%arg0: i32, %arg1: i32) -> (i32, i32, i32) {
    %c0_i32 = arith.constant 0 : i32
    %c0_i32_0 = arith.constant 0 : i32
    %c0_i32_1 = arith.constant 0 : i32
    return %arg1, %c0_i32, %c0_i32_0 : i32, i32, i32
  }
  func.func @transform_16(%arg0: i32, %arg1: i32) -> (i32, i32, i32) {
    %c0_i32 = arith.constant 0 : i32
    %c0_i32_0 = arith.constant 0 : i32
    %c0_i32_1 = arith.constant 0 : i32
    return %arg1, %c0_i32, %c0_i32_0 : i32, i32, i32
  }
  func.func @transform_17(%arg0: i32, %arg1: i32) -> (i32, i32, i32) {
    %c0_i32 = arith.constant 0 : i32
    %c0_i32_0 = arith.constant 0 : i32
    %c0_i32_1 = arith.constant 0 : i32
    return %arg1, %c0_i32, %c0_i32_0 : i32, i32, i32
  }
  func.func @transform_18(%arg0: i32, %arg1: i32) -> (i32, i32, i32) {
    %c0_i32 = arith.constant 0 : i32
    %c0_i32_0 = arith.constant 0 : i32
    %c0_i32_1 = arith.constant 0 : i32
    return %arg1, %c0_i32, %c0_i32_0 : i32, i32, i32
  }
  func.func @transform_19(%arg0: i32, %arg1: i32) -> (i32, i32, i32) {
    %c0_i32 = arith.constant 0 : i32
    %c0_i32_0 = arith.constant 0 : i32
    %c0_i32_1 = arith.constant 0 : i32
    return %arg1, %c0_i32, %c0_i32_0 : i32, i32, i32
  }
  func.func @transform_20(%arg0: i32, %arg1: i32) -> (i32, i32, i32) {
    %c0_i32 = arith.constant 0 : i32
    %c0_i32_0 = arith.constant 0 : i32
    %c0_i32_1 = arith.constant 0 : i32
    return %arg1, %c0_i32, %c0_i32_0 : i32, i32, i32
  }
  func.func @transform_21(%arg0: i32, %arg1: i32) -> (i32, i32) {
    %c0_i32 = arith.constant 0 : i32
    %c0_i32_0 = arith.constant 0 : i32
    return %arg0, %c0_i32 : i32, i32
  }
}

</mosaic_0001>

<bundles_post_ra>
// kernel: tpu_custom_call.1
= control target key start
LH: loop header
LB: loop body
LE: loop exit
PB: predicated region body
PF: predicated region fallthrough
CT: control target
= control target key end

     0   :  { %s4100_s25 = smov 0   ;;  %s4102_s26 = smov 0   ;;  %s4623_s0 = inlined_call_operand.vmem [shape: bf16[64,768], index: 0, kind: input, shape index: {}]   ;;  %s4624_s1 = inlined_call_operand.vmem [shape: bf16[768,32], index: 1, kind: input, shape index: {}]   ;;  %s4625_s2 = inlined_call_operand.vmem [shape: f32[1,32], index: 2, kind: input, shape index: {}]   ;;  %s4626_s3 = inlined_call_operand.vmem [shape: f32[1,32], index: 3, kind: input, shape index: {}]   ;;  %s4627_s4 = inlined_call_operand.vmem [shape: f32[1,32], index: 4, kind: input, shape index: {}]   ;;  %s4628_s5 = inlined_call_operand.vmem [shape: bf16[2,2,32,16], index: 5, kind: input, shape index: {}]   ;;  %s4629_s6 = inlined_call_operand.vmem [shape: f32[2,2,1,16], index: 6, kind: input, shape index: {}]   ;;  %s4630_s7 = inlined_call_operand.vmem [shape: bf16[2,2,32,16], index: 7, kind: input, shape index: {}]   ;;  %s4631_s8 = inlined_call_operand.vmem [shape: f32[2,2,1,16], index: 8, kind: input, shape index: {}]   ;;  %s4632_s9 = inlined_call_operand.vmem [shape: bf16[2,2,32,16], index: 9, kind: input, shape index: {}]   ;;  %s4633_s10 = inlined_call_operand.vmem [shape: f32[2,2,1,16], index: 10, kind: input, shape index: {}]   ;;  %s4634_s11 = inlined_call_operand.vmem [shape: bf16[2,2,16,32], index: 11, kind: input, shape index: {}]   ;;  %s4635_s12 = inlined_call_operand.vmem [shape: f32[2,1,32], index: 12, kind: input, shape index: {}]   ;;  %s4636_s13 = inlined_call_operand.vmem [shape: f32[2,1,32], index: 13, kind: input, shape index: {}]   ;;  %s4637_s14 = inlined_call_operand.vmem [shape: f32[2,1,32], index: 14, kind: input, shape index: {}]   ;;  %s4638_s15 = inlined_call_operand.vmem [shape: bf16[2,32,64], index: 15, kind: input, shape index: {}]   ;;  %s4639_s16 = inlined_call_operand.vmem [shape: f32[2,1,64], index: 16, kind: input, shape index: {}]   ;;  %s4640_s17 = inlined_call_operand.vmem [shape: bf16[2,64,32], index: 17, kind: input, shape index: {}]   ;;  %s4641_s18 = inlined_call_operand.vmem [shape: f32[2,1,32], index: 18, kind: input, shape index: {}]   ;;  %s4642_s19 = inlined_call_operand.vmem [shape: f32[2,1,32], index: 19, kind: input, shape index: {}]   ;;  %s4643_s20 = inlined_call_operand.vmem [shape: f32[2,1,32], index: 20, kind: input, shape index: {}]   ;;  %s4644_s21 = inlined_call_operand.vmem [shape: f32[64,32], index: 21, kind: output, shape index: {}]  }
   0x1   :  { %4653 = sst [smem:[#allocation12_spill]] %s4623_s0  ;;  %s4104_s27 = smov 0  }
   0x2   :  { %4654 = sst [smem:[#allocation13_spill]] %s4624_s1 }
   0x3   :  { %4655 = sst [smem:[#allocation14_spill]] %s4625_s2  ;;  %s4098_s2 = smov 0  }
   0x4   :  { %4656 = sst [smem:[#allocation15_spill]] %s4626_s3  ;;  %s4106_s3 = smov 0  }
   0x5   :  { %4657 = sst [smem:[#allocation16_spill]] %s4627_s4 }
   0x6   :  { %4658 = sst [smem:[#allocation17_spill]] %s4628_s5 }
   0x7   :  { %4659 = sst [smem:[#allocation18_spill]] %s4629_s6 }
   0x8   :  { %4660 = sst [smem:[#allocation19_spill]] %s4630_s7 }
   0x9   :  { %4661 = sst [smem:[#allocation20_spill]] %s4631_s8 }
   0xa   :  { %4662 = sst [smem:[#allocation21_spill]] %s4632_s9 }
   0xb   :  { %4663 = sst [smem:[#allocation22_spill]] %s4633_s10 }
   0xc   :  { %4664 = sst [smem:[#allocation23_spill]] %s4634_s11 }
   0xd   :  { %4665 = sst [smem:[#allocation24_spill]] %s4636_s13 }
   0xe   :  { %4666 = sst [smem:[#allocation25_spill]] %s4637_s14 }
   0xf   :  { %4667 = sst [smem:[#allocation26_spill]] %s4638_s15 }
  0x10   :  { %4668 = sst [smem:[#allocation27_spill]] %s4639_s16 }
  0x11   :  { %4669 = sst [smem:[#allocation28_spill]] %s4641_s18 }
  0x12   :  { %4670 = sst [smem:[#allocation29_spill]] %s4642_s19 }
  0x13   :  { %4671 = sst [smem:[#allocation30_spill]] %s4643_s20 }
  0x14   :  { %4672 = sst [smem:[#allocation31_spill]] %s4644_s21 }
  0x15 LB: > { %4673 = sst [smem:[#allocation3_spill]] %s3968_s2  ;;  %s40_s28 = sadd.s32 1, %s3976_s26  ;;  %s3984_s3 = sphi %s4106_s3, %s31_s3   ;;  %s3980_s27 = sphi %s4104_s27, %s4721_s27   ;;  %s3976_s26 = sphi %s4102_s26, %s4720_s26   ;;  %s3972_s25 = sphi %s4100_s25, %s4719_s25   ;;  %s3968_s2 = sphi %s4098_s2, %s4718_s2  }
  0x16   : > { %4674 = sst [smem:[#allocation4_spill]] %s3976_s26  ;;  %s43_s29 = sadd.s32 1, %s3980_s27 }
  0x17   : > { %4675 = sst [smem:[#allocation5_spill]] %s3980_s27  ;;  %p41_p0 = scmp.ge.s32.totalorder %s40_s28, 2 }
  0x18   : > { %4676 = sst [smem:[#allocation6_spill]] %s3984_s3  ;;  %p3302_p1 = scmp.ge.s32.totalorder %s3984_s3, 1 }
  0x19   : > { %p744_p2 = scmp.lt.s32.totalorder %s3984_s3, 5  ;;  %s4723_s28 = smov (%p41_p0, %s40_s28), 0 }
  0x1a   : > { %4677 = sst [smem:[#allocation7_spill]] %s4723_s28  ;;  %s4725_s29 = smov (!%p41_p0, %s43_s29), %s3980_s27 }
  0x1b   : > { %p745_p3 = pnand %p3302_p1, %p744_p2  ;;  %p45_p4 = scmp.ge.s32.totalorder %s4725_s29, 2 }
  0x1d   : > { %s4727_s29 = smov (%p45_p4, %s4725_s29), 0  ;;  %748 = sbr.rel (%p745_p3) target bundleno = 3733 (0xe95), region = 104 }
  0x1e   : > { %4678 = sst [smem:[#allocation8_spill]] %s4727_s29 }
  0x24   : > { %s3303_s0 = sshll.u32 %s3972_s25, 2  ;;  %p875_p5 = scmp.lt.s32.totalorder %s3968_s2, 1 }
  0x25   : > { %p869_p6 = scmp.lt.s32.totalorder %s3303_s0, 7  ;;  %s4679_s24 = sld [smem:[#allocation17_spill]] }
  0x26   : > { %s4132_s4 = scalar_select %p875_p5, %s3968_s2, 1 }
  0x27   : > { %s4729_s0 = smov (!%p869_p6, %s3303_s0), 7  ;;  %s4681_s6 = sld [smem:[#allocation18_spill]] }
  0x28   : > { %s3467_s30 = sshll.u32 %s4132_s4, 5  ;;  %s3307_s5 = sshll.u32 %s4132_s4, 1 }
  0x29   : > { %s3761_s22 = smul.u32 24, %s4729_s0  ;;  %s4683_s7 = sld [smem:[#allocation19_spill]] }
  0x2a   : > { %s4684_s19 = sld [smem:[#allocation12_spill]]  ;;  %s4686_s9 = sld [smem:[#allocation21_spill]] }
  0x2b   : > { %s4139_s25 = scalar_lea.vmem %s4679_s24, %s3467_s30  ;;  %s4685_s8 = sld [smem:[#allocation20_spill]] }
  0x2c   : > { %4680 = sst [smem:[#allocation9_spill]] %s4139_s25  ;;  %s4687_s10 = sld [smem:[#allocation22_spill]] }
  0x2d   : > { %s4144_s27 = scalar_lea.vmem %s4681_s6, %s3307_s5  ;;  %s4688_s11 = sld [smem:[#allocation23_spill]] }
  0x2e   : > { %4682 = sst [smem:[#allocation10_spill]] %s4144_s27  ;;  %s4694_s28 = sld [smem:[#allocation28_spill]] }
  0x2f   : > { %s4149_s2 = scalar_lea.vmem %s4683_s7, %s3467_s30  ;;  %s3470_s7 = sshll.u32 %s4132_s4, 4 }
  0x30   : > { %s4154_s18 = scalar_lea.vmem %s4684_s19, %s3761_s22  ;;  %s4164_s6 = scalar_lea.vmem %s4686_s9, %s3467_s30 }
  0x31   : > { %s4159_s24 = scalar_lea.vmem %s4685_s8, %s3307_s5  ;;  %s4691_s15 = sld [smem:[#allocation26_spill]] }
  0x32   : > { %s4169_s3 = scalar_lea.vmem %s4687_s10, %s3307_s5  ;;  %s4695_s27 = sld [smem:[#allocation29_spill]] }
  0x33   : > { %s4179_s23 = scalar_lea.vmem %s4688_s11, %s3470_s7  ;;  %s4201_s11 = scalar_lea.vmem %s4640_s17, %s3467_s30 }
  0x34   : > { %s931_s13 = scalar_lea.vmem %s4694_s28, %s4132_s4  ;;  %s4696_s26 = sld [smem:[#allocation30_spill]] }
  0x35   : > { %s4697_s19 = sld [smem:[#allocation31_spill]]  ;;  %s4698_s30 = sld [smem:[#allocation3_spill]] }
  0x37   : > { %s4192_s10 = scalar_lea.vmem %s4691_s15, %s3470_s7 }
  0x38   : > { %4692 = sst [smem:[#allocation11_spill]] %s4192_s10  ;;  %s934_s14 = scalar_lea.vmem %s4695_s27, %s4132_s4 }
  0x39   : > { %s3321_s10 = sshll.u32 %s4729_s0, 3 }
  0x3a   : > { %s937_s15 = scalar_lea.vmem %s4696_s26, %s4132_s4 }
  0x3b   : > { %s4218_s16 = scalar_lea.vmem %s4697_s19, %s3321_s10  ;;  %p3322_p7 = scmp.ne.s32.totalorder %s4698_s30, 0 }
  0x3c   : > { %s4699_s28 = sld [smem:[#allocation13_spill]] (!%p3322_p7)  ;;  %v3836_v32 = vld [vmem:[%s4154_s18] ss:$24 sps:$4 sm:$0xff] (!%p3322_p7)   ;;  %v3838_v33 = vld [vmem:[%s4154_s18 + $0x4] ss:$24 sps:$4 sm:$0xff] (!%p3322_p7)   ;;  %s4700_s8 = sld [smem:[#allocation14_spill]] (!%p3322_p7) }
  0x3d   : > { %948 = sbr.rel (%p3322_p7) target bundleno = 671 (0x29f), region = 108  ;;  %v3839_v34 = vld [vmem:[%s4154_s18 + $0x8] ss:$24 sps:$4 sm:$0xff] (!%p3322_p7)   ;;  %v3841_v35 = vld [vmem:[%s4154_s18 + $0xc] ss:$24 sps:$4 sm:$0xff] (!%p3322_p7)   ;;  %1444 = vmatprep.mubr.bf16.mxu0 (!%p3322_p7), %v3838_v33  ;;  %vm1561_vm0 = vcmask (!%p3322_p7), 261120  }
  0x3e   : > { %1493 = vmatprep.mubr.bf16.mxu1 (!%p3322_p7), %v3841_v35  ;;  %v3852_v43 = vld [vmem:[%s4154_s18 + $0x34] ss:$24 sps:$4 sm:$0xff] (!%p3322_p7)   ;;  %v3855_v45 = vld [vmem:[%s4154_s18 + $0x30] ss:$24 sps:$4 sm:$0xff] (!%p3322_p7)   ;;  %v3869_v54 = vld [vmem:[%s4154_s18 + $0x44] ss:$24 sps:$4 sm:$0xff] (!%p3322_p7)  }
  0x3f   : > { %v3857_v47 = vld [vmem:[%s4154_s18 + $0x3c] ss:$24 sps:$4 sm:$0xff] (!%p3322_p7)   ;;  %v3859_v48 = vld [vmem:[%s4154_s18 + $0x38] ss:$24 sps:$4 sm:$0xff] (!%p3322_p7)   ;;  %s4701_s27 = sld [smem:[#allocation15_spill]] (!%p3322_p7)  ;;  %s4702_s10 = sld [smem:[#allocation16_spill]] (!%p3322_p7) }
  0x40   : > { %v3866_v52 = vld [vmem:[%s4154_s18 + $0x14] ss:$24 sps:$4 sm:$0xff] (!%p3322_p7)   ;;  %v3864_v58 = vld [vmem:[%s4154_s18 + $0x10] ss:$24 sps:$4 sm:$0xff] (!%p3322_p7)   ;;  %v3867_v59 = vld [vmem:[%s4154_s18 + $0x40] ss:$24 sps:$4 sm:$0xff] (!%p3322_p7)  }
  0x42   : > { %v3804_v0 = vld [vmem:[%s4699_s28 + $0x40] sm:$0xff] (!%p3322_p7)   ;;  %v3808_v4 = vld [vmem:[%s4699_s28 + $0x48] sm:$0xff] (!%p3322_p7)   ;;  %v3812_v8 = vld [vmem:[%s4699_s28 + $0x50] sm:$0xff] (!%p3322_p7)  }
  0x43   : > { %v3805_v1 = vld [vmem:[%s4699_s28 + $0xc0] sm:$0xff] (!%p3322_p7)   ;;  %3473 = vmatprep.subr.bf16.mxu0 (!%p3322_p7), %v3804_v0  ;;  %v3809_v5 = vld [vmem:[%s4699_s28 + $0xc8] sm:$0xff] (!%p3322_p7)   ;;  %v3813_v9 = vld [vmem:[%s4699_s28 + $0xd0] sm:$0xff] (!%p3322_p7)  }
  0x44   : > { %v3806_v2 = vld [vmem:[%s4699_s28] sm:$0xff]   ;;  %3501 = vmatprep.subr.bf16.mxu1 %v3805_v1  ;;  %v3810_v6 = vld [vmem:[%s4699_s28 + $0x8] sm:$0xff]   ;;  %v3814_v10 = vld [vmem:[%s4699_s28 + $0x10] sm:$0xff]  }
  0x45   : > { %v3807_v3 = vld [vmem:[%s4699_s28 + $0x80] sm:$0xff]   ;;  %3474 = vmatpush3.bf16.msra.mxu0 %v3806_v2  ;;  %v3811_v7 = vld [vmem:[%s4699_s28 + $0x88] sm:$0xff]   ;;  %v3815_v11 = vld [vmem:[%s4699_s28 + $0x90] sm:$0xff]  }
  0x46   : > { %3502 = vmatpush3.bf16.msra.mxu1 %v3807_v3  ;;  %3475 = vmatprep.subr.bf16.mxu0 %v3808_v4  ;;  %v3816_v12 = vld [vmem:[%s4699_s28 + $0x58] sm:$0xff]   ;;  %v3820_v16 = vld [vmem:[%s4699_s28 + $0x60] sm:$0xff]   ;;  %v3824_v20 = vld [vmem:[%s4699_s28 + $0x68] sm:$0xff]  }
  0x47   : > { %3503 = vmatprep.subr.bf16.mxu1 %v3809_v5  ;;  %v3817_v13 = vld [vmem:[%s4699_s28 + $0xd8] sm:$0xff]   ;;  %v3821_v17 = vld [vmem:[%s4699_s28 + $0xe0] sm:$0xff]   ;;  %v3825_v21 = vld [vmem:[%s4699_s28 + $0xe8] sm:$0xff]  }
  0x48   : > { %v3818_v14 = vld [vmem:[%s4699_s28 + $0x18] sm:$0xff]   ;;  %v3822_v18 = vld [vmem:[%s4699_s28 + $0x20] sm:$0xff]   ;;  %v3826_v22 = vld [vmem:[%s4699_s28 + $0x28] sm:$0xff]  }
  0x49   : > { %3476 = vmatpush3.bf16.msra.mxu0 %v3810_v6  ;;  %v3819_v15 = vld [vmem:[%s4699_s28 + $0x98] sm:$0xff]   ;;  %v3823_v19 = vld [vmem:[%s4699_s28 + $0xa0] sm:$0xff]   ;;  %v3827_v23 = vld [vmem:[%s4699_s28 + $0xa8] sm:$0xff]  }
  0x4a   : > { %3504 = vmatpush3.bf16.msra.mxu1 %v3811_v7  ;;  %3477 = vmatprep.subr.bf16.mxu0 %v3812_v8  ;;  %v3828_v24 = vld [vmem:[%s4699_s28 + $0x70] sm:$0xff]   ;;  %v3832_v28 = vld [vmem:[%s4699_s28 + $0x78] sm:$0xff]   ;;  %v3842_v36 = vld [vmem:[%s4699_s28 + $0x140] sm:$0xff]  }
  0x4b   : > { %3505 = vmatprep.subr.bf16.mxu1 %v3813_v9  ;;  %v3829_v25 = vld [vmem:[%s4699_s28 + $0xf0] sm:$0xff]   ;;  %v3833_v29 = vld [vmem:[%s4699_s28 + $0xf8] sm:$0xff]   ;;  %v3843_v37 = vld [vmem:[%s4699_s28 + $0x100] sm:$0xff]  }
  0x4c   : > { %v3830_v26 = vld [vmem:[%s4699_s28 + $0x30] sm:$0xff]   ;;  %v3834_v30 = vld [vmem:[%s4699_s28 + $0x38] sm:$0xff]   ;;  %v3844_v38 = vld [vmem:[%s4699_s28 + $0x148] sm:$0xff]  }
  0x4d   : > { %3478 = vmatpush3.bf16.msra.mxu0 %v3814_v10  ;;  %v3831_v27 = vld [vmem:[%s4699_s28 + $0xb0] sm:$0xff]   ;;  %v3835_v31 = vld [vmem:[%s4699_s28 + $0xb8] sm:$0xff]   ;;  %v3845_v39 = vld [vmem:[%s4699_s28 + $0x108] sm:$0xff]  }
  0x4e   : > { %3506 = vmatpush3.bf16.msra.mxu1 %v3815_v11  ;;  %3479 = vmatprep.subr.bf16.mxu0 %v3816_v12  ;;  %v3846_v40 = vld [vmem:[%s4699_s28 + $0x150] sm:$0xff]   ;;  %v3848_v42 = vld [vmem:[%s4699_s28 + $0x158] sm:$0xff]   ;;  %v3850_v46 = vld [vmem:[%s4699_s28 + $0x160] sm:$0xff]  }
  0x4f   : > { %3507 = vmatprep.subr.bf16.mxu1 %v3817_v13  ;;  %v3847_v41 = vld [vmem:[%s4699_s28 + $0x110] sm:$0xff]   ;;  %v3849_v44 = vld [vmem:[%s4699_s28 + $0x118] sm:$0xff]   ;;  %v3851_v49 = vld [vmem:[%s4699_s28 + $0x120] sm:$0xff]  }
  0x50   : > { %v3854_v50 = vld [vmem:[%s4699_s28 + $0x168] sm:$0xff]   ;;  %v3860_v53 = vld [vmem:[%s4699_s28 + $0x170] sm:$0xff]   ;;  %v3862_v56 = vld [vmem:[%s4699_s28 + $0x178] sm:$0xff]  }
  0x51   : > { %3480 = vmatpush3.bf16.msra.mxu0 %v3818_v14  ;;  %v3856_v51 = vld [vmem:[%s4699_s28 + $0x128] sm:$0xff]   ;;  %v3861_v55 = vld [vmem:[%s4699_s28 + $0x130] sm:$0xff]   ;;  %v3863_v57 = vld [vmem:[%s4699_s28 + $0x138] sm:$0xff]  }
  0x52   : > { %3508 = vmatpush3.bf16.msra.mxu1 %v3819_v15  ;;  %3481 = vmatprep.subr.bf16.mxu0 %v3820_v16  ;;  %v3323_v61 = vld [vmem:[%s4700_s8] ss:$0 sm:$0xff] }
  0x53   : > { %3509 = vmatprep.subr.bf16.mxu1 %v3821_v17 }
  0x55   : > { %3482 = vmatpush3.bf16.msra.mxu0 %v3822_v18 }
  0x56   : > { %3510 = vmatpush3.bf16.msra.mxu1 %v3823_v19  ;;  %3483 = vmatprep.subr.bf16.mxu0 %v3824_v20 }
  0x57   : > { %3511 = vmatprep.subr.bf16.mxu1 %v3825_v21 }
  0x59   : > { %3484 = vmatpush3.bf16.msra.mxu0 %v3826_v22 }
  0x5a   : > { %3512 = vmatpush3.bf16.msra.mxu1 %v3827_v23  ;;  %3485 = vmatprep.subr.bf16.mxu0 %v3828_v24 }
  0x5b   : > { %3513 = vmatprep.subr.bf16.mxu1 %v3829_v25 }
  0x5d   : > { %3486 = vmatpush3.bf16.msra.mxu0 %v3830_v26 }
  0x5e   : > { %3514 = vmatpush3.bf16.msra.mxu1 %v3831_v27  ;;  %3487 = vmatprep.subr.bf16.mxu0 %v3832_v28 }
  0x5f   : > { %3515 = vmatprep.subr.bf16.mxu1 %v3833_v29 }
  0x61   : > { %3488 = vmatpush3.bf16.msra.mxu0 %v3834_v30 }
  0x62   : > { %3516 = vmatpush3.bf16.msra.mxu1 %v3835_v31  ;;  %3529 = vmatprep.subr.bf16.mxu0 %v3842_v36 }
  0x63   : > { %3741 = vmatprep.subr.bf16.mxu1 %v3842_v36 }
  0x64   : > { %1445 = vmatmul.mubr.bf16.vlgmr.msra.gmra.mrb[0].mxu0 %v3836_v32 }
  0x65   : > { %1494 = vmatmul.mubr.bf16.vlgmr.msra.gmra.mrb[0].mxu1 %v3839_v34  ;;  %3530 = vmatpush3.bf16.msra.mxu0 %v3843_v37 }
  0x66   : > { %3749 = vmatpush3.bf16.msra.mxu1 %v3843_v37  ;;  %3531 = vmatprep.subr.bf16.mxu0 %v3844_v38 }
  0x67   : > { %3742 = vmatprep.subr.bf16.mxu1 %v3844_v38  ;;  %1452 = vmatprep.mubr.bf16.mxu0 %v3852_v43 }
  0x68   : > { %1501 = vmatprep.mubr.bf16.mxu1 %v3857_v47 }
  0x69   : > { %3532 = vmatpush3.bf16.msra.mxu0 %v3845_v39 }
  0x6a   : > { %3750 = vmatpush3.bf16.msra.mxu1 %v3845_v39  ;;  %3533 = vmatprep.subr.bf16.mxu0 %v3846_v40 }
  0x6b   : > { %3743 = vmatprep.subr.bf16.mxu1 %v3846_v40 }
  0x6c   : > { %1453 = vmatmul.mubr.bf16.gmra.mrb[4].mxu0 %v3855_v45 }
  0x6d   : > { %3534 = vmatpush3.bf16.msra.mxu0 %v3847_v41  ;;  %1502 = vmatmul.mubr.bf16.gmra.mrb[4].mxu1 %v3859_v48 }
  0x6e   : > { %3751 = vmatpush3.bf16.msra.mxu1 %v3847_v41  ;;  %3535 = vmatprep.subr.bf16.mxu0 %v3848_v42 }
  0x6f   : > { %3744 = vmatprep.subr.bf16.mxu1 %v3848_v42  ;;  %1542 = vmatprep.mubr.bf16.mxu0 %v3866_v52 }
  0x70   : > { %1550 = vmatprep.mubr.bf16.mxu1 %v3869_v54 }
  0x71   : > { %3536 = vmatpush3.bf16.msra.mxu0 %v3849_v44 }
  0x72   : > { %3752 = vmatpush3.bf16.msra.mxu1 %v3849_v44  ;;  %3537 = vmatprep.subr.bf16.mxu0 %v3850_v46 }
  0x73   : > { %3745 = vmatprep.subr.bf16.mxu1 %v3850_v46 }
  0x75   : > { %3538 = vmatpush3.bf16.msra.mxu0 %v3851_v49 }
  0x76   : > { %3753 = vmatpush3.bf16.msra.mxu1 %v3851_v49  ;;  %3539 = vmatprep.subr.bf16.mxu0 %v3854_v50 }
  0x77   : > { %3746 = vmatprep.subr.bf16.mxu1 %v3854_v50 }
  0x79   : > { %3540 = vmatpush3.bf16.msra.mxu0 %v3856_v51 }
  0x7a   : > { %3754 = vmatpush3.bf16.msra.mxu1 %v3856_v51  ;;  %3541 = vmatprep.subr.bf16.mxu0 %v3860_v53 }
  0x7b   : > { %3747 = vmatprep.subr.bf16.mxu1 %v3860_v53 }
  0x7d   : > { %3542 = vmatpush3.bf16.msra.mxu0 %v3861_v55 }
  0x7e   : > { %3755 = vmatpush3.bf16.msra.mxu1 %v3861_v55  ;;  %3543 = vmatprep.subr.bf16.mxu0 %v3862_v56 }
  0x7f   : > { %3748 = vmatprep.subr.bf16.mxu1 %v3862_v56 }
  0x81   : > { %3544 = vmatpush3.bf16.msra.mxu0 %v3863_v57 }
  0x82   : > { %3756 = vmatpush3.bf16.msra.mxu1 %v3863_v57 }
  0x84   : > { %1543 = vmatmul.mubr.bf16.vlgmr.msra.gmra.mrb[8].mxu0 %v3864_v58 }
  0x85   : > { %1551 = vmatmul.mubr.bf16.vlgmr.msra.gmra.mrb[8].mxu1 %v3867_v59 }
 0x137   : > { %v3489_v60 = vpop.f32.mrb[0].mxu0 }
 0x138   : > { %v3490_v62 = vpop.f32.mrb[1].mxu0  ;;  %v3517_v1 = vpop.f32.mrb[0].mxu1 }
 0x139   : > { %v3491_v63 = vadd.f32 %v3490_v62, %v3489_v60  ;;  %v3492_v0 = vpop.f32.mrb[2].mxu0  ;;  %v3518_v3 = vpop.f32.mrb[1].mxu1 }
 0x13a   : > { %v3493_v2 = vpop.f32.mrb[3].mxu0  ;;  %v3519_v6 = vadd.f32 %v3518_v3, %v3517_v1  ;;  %v3520_v7 = vpop.f32.mrb[2].mxu1 }
 0x13b   : > { %v1447_v4 = vadd.f32 %v3491_v63, %v3323_v61  ;;  %v3494_v5 = vadd.f32 %v3493_v2, %v3492_v0  ;;  %v3521_v8 = vpop.f32.mrb[3].mxu1 }
 0x13c   : > { %v3522_v11 = vadd.f32 %v3521_v8, %v3520_v7 }
 0x13d   : > { %v1450_v9 = vadd.f32 %v3494_v5, %v3323_v61  ;;  %v1496_v10 = vadd.f32 %v3519_v6, %v1447_v4 }
 0x13f   : > { %v1499_v12 = vadd.f32 %v3522_v11, %v1450_v9  ;;  %v3495_v13 = vpop.f32.mrb[4].mxu0 }
 0x140   : > { %v3496_v14 = vpop.f32.mrb[5].mxu0  ;;  %v3523_v17 = vpop.f32.mrb[4].mxu1 }
 0x141   : > { %v3497_v15 = vadd.f32 %v3496_v14, %v3495_v13  ;;  %v3498_v16 = vpop.f32.mrb[6].mxu0  ;;  %v3524_v21 = vpop.f32.mrb[5].mxu1 }
 0x142   : > { %v3499_v18 = vpop.f32.mrb[7].mxu0  ;;  %v3525_v22 = vadd.f32 %v3524_v21, %v3523_v17  ;;  %v3526_v23 = vpop.f32.mrb[6].mxu1 }
 0x143   : > { %v1455_v19 = vadd.f32 %v3497_v15, %v3323_v61  ;;  %v3500_v20 = vadd.f32 %v3499_v18, %v3498_v16  ;;  %v3527_v25 = vpop.f32.mrb[7].mxu1  ;;  %v3384_v18 = vld [vmem:[%s4701_s27] ss:$0 sm:$0xff] }
 0x144   : > { %v3528_v27 = vadd.f32 %v3527_v25, %v3526_v23 }
 0x145   : > { %v1458_v24 = vadd.f32 %v3500_v20, %v3323_v61  ;;  %v1504_v26 = vadd.f32 %v3525_v22, %v1455_v19  ;;  %v3385_v20 = vld [vmem:[%s4702_s10] ss:$0 sm:$0xff] }
 0x147   : > { %v1507_v28 = vadd.f32 %v3528_v27, %v1458_v24 }
 0x157   : > { %v3545_v29 = vpop.f32.mrb[8].mxu0 }
 0x158   : > { %v3551_v30 = vpop.f32.mrb[8].mxu1  ;;  %v3546_v31 = vpop.f32.mrb[9].mxu0 }
 0x159   : > { %v3547_v32 = vadd.f32 %v3546_v31, %v3545_v29  ;;  %v3552_v33 = vpop.f32.mrb[9].mxu1  ;;  %v3548_v34 = vpop.f32.mrb[10].mxu0 }
 0x15a   : > { %v3553_v35 = vadd.f32 %v3552_v33, %v3551_v30  ;;  %v3554_v36 = vpop.f32.mrb[10].mxu1  ;;  %v3549_v37 = vpop.f32.mrb[11].mxu0 }
 0x15b   : > { %v3550_v38 = vadd.f32 %v3549_v37, %v3548_v34  ;;  %v3555_v39 = vpop.f32.mrb[11].mxu1  ;;  %v1545_v40 = vadd.f32 %v3547_v32, %v1496_v10 }
 0x15c   : > { %v3556_v41 = vadd.f32 %v3555_v39, %v3554_v36  ;;  %v1553_v42 = vadd.f32 %v3553_v35, %v1504_v26 }
 0x15d   : > { %v1562_v43 = vsel %vm1561_vm0, %v1545_v40, 0.0  ;;  %v1548_v44 = vadd.f32 %v3550_v38, %v1499_v12 }
 0x15e   : > { %v1568_v45 = vsel %vm1561_vm0, %v1553_v42, 0.0  ;;  %1563 = vadd.xlane.f32.xlu0 %v1562_v43  ;;  %v1556_v46 = vadd.f32 %v3556_v41, %v1507_v28 }
 0x15f   : > { %1569 = vadd.xlane.f32.xlu1 %v1568_v45  ;;  %v1565_v47 = vsel %vm1561_vm0, %v1548_v44, 0.0 }
 0x160   : > { %v1571_v48 = vsel %vm1561_vm0, %v1556_v46, 0.0 }
 0x162   : > { %1566 = vadd.xlane.f32.xlu0 %v1565_v47 }
 0x163   : > { %1572 = vadd.xlane.f32.xlu1 %v1571_v48 }
 0x1eb   : > { %v1564_v49 = vpop.xlane.xlu0 %1563 }
 0x1ec   : > { %v1570_v50 = vpop.xlane.xlu1 %1569  ;;  %v1575_v51 = vmul.f32 0.03125, %v1564_v49 }
 0x1ed   : > { %v1577_v52 = vmul.f32 0.03125, %v1570_v50 }
 0x1ee   : > { %v1579_v53 = vsub.f32 %v1545_v40, %v1575_v51 }
 0x1ef   : > { %v1581_v54 = vsub.f32 %v1553_v42, %v1577_v52  ;;  %v1567_v55 = vpop.xlane.xlu0 %1566 }
 0x1f0   : > { %v1573_v56 = vpop.xlane.xlu1 %1572  ;;  %v1576_v57 = vmul.f32 0.03125, %v1567_v55  ;;  %v1583_v58 = vmul.f32 %v1579_v53, %v1579_v53 }
 0x1f1   : > { %v1578_v59 = vmul.f32 0.03125, %v1573_v56  ;;  %v1585_v62 = vmul.f32 %v1581_v54, %v1581_v54 }
 0x1f2   : > { %v1580_v60 = vsub.f32 %v1548_v44, %v1576_v57  ;;  %v1587_v61 = vsel %vm1561_vm0, %v1583_v58, 0.0 }
 0x1f3   : > { %v1582_v63 = vsub.f32 %v1556_v46, %v1578_v59  ;;  %1588 = vadd.xlane.f32.xlu0 %v1587_v61  ;;  %v1593_v1 = vsel %vm1561_vm0, %v1585_v62, 0.0 }
 0x1f4   : > { %v1584_v0 = vmul.f32 %v1580_v60, %v1580_v60 }
 0x1f5   : > { %v1586_v3 = vmul.f32 %v1582_v63, %v1582_v63 }
 0x1f6   : > { %v1590_v2 = vsel %vm1561_vm0, %v1584_v0, 0.0 }
 0x1f7   : > { %1594 = vadd.xlane.f32.xlu0 %v1593_v1  ;;  %1591 = vadd.xlane.f32.xlu1 %v1590_v2  ;;  %v1596_v4 = vsel %vm1561_vm0, %v1586_v3, 0.0 }
 0x1fb   : > { %1597 = vadd.xlane.f32.xlu1 %v1596_v4 }
 0x280   : > { %v1589_v5 = vpop.xlane.xlu0 %1588 }
 0x281   : > { %v1599_v6 = vmul.f32 0.03125, %v1589_v5 }
 0x283   : > { %v1603_v7 = vadd.f32 1e-06, %v1599_v6 }
 0x284   : > { %v1592_v8 = vpop.xlane.xlu1 %1591  ;;  %v1595_v9 = vpop.xlane.xlu0 %1594 }
 0x285   : > { %3870 = vrsqrt.f32 %v1603_v7  ;;  %v1600_v10 = vmul.f32 0.03125, %v1592_v8  ;;  %v1601_v11 = vmul.f32 0.03125, %v1595_v9 }
 0x287   : > { %v1604_v12 = vadd.f32 1e-06, %v1600_v10  ;;  %v1605_v13 = vadd.f32 1e-06, %v1601_v11 }
 0x288   : > { %v1598_v14 = vpop.xlane.xlu1 %1597 }
 0x289   : > { %3872 = vrsqrt.f32 %v1604_v12  ;;  %v1602_v15 = vmul.f32 0.03125, %v1598_v14 }
 0x28a   : > { %3874 = vrsqrt.f32 %v1605_v13 }
 0x28b   : > { %v1606_v16 = vadd.f32 1e-06, %v1602_v15 }
 0x28d   : > { %3876 = vrsqrt.f32 %v1606_v16 }
 0x28f   : > { %v3871_v17 = vpop.eup %3870 }
 0x290   : > { %v1611_v19 = vmul.f32 %v3871_v17, %v1579_v53 }
 0x292   : > { %v1621_v21 = vmul.f32 %v3384_v18, %v1611_v19 }
 0x293   : > { %v3873_v22 = vpop.eup %3872 }
 0x294   : > { %v3875_v23 = vpop.eup %3874  ;;  %v1631_v24 = vadd.f32 %v3385_v20, %v1621_v21  ;;  %v1612_v25 = vmul.f32 %v3873_v22, %v1580_v60 }
 0x295   : > { %v1613_v26 = vmul.f32 %v3875_v23, %v1581_v54 }
 0x296   : > { %1635 = vst.msk [vmem:[#allocation2] sm:$0xff] %vm1561_vm0, %v1631_v24  ;;  %v1622_v27 = vmul.f32 %v3384_v18, %v1612_v25 }
 0x297   : > { %v3877_v28 = vpop.eup %3876  ;;  %v1623_v29 = vmul.f32 %v3384_v18, %v1613_v26 }
 0x298   : > { %v1632_v30 = vadd.f32 %v3385_v20, %v1622_v27  ;;  %v1614_v31 = vmul.f32 %v3877_v28, %v1582_v63 }
 0x299   : > { %v1633_v32 = vadd.f32 %v3385_v20, %v1623_v29 }
 0x29a   : > { %1636 = vst.msk [vmem:[#allocation2 + $0x8] sm:$0xff] %vm1561_vm0, %v1632_v30  ;;  %v1624_v33 = vmul.f32 %v3384_v18, %v1614_v31 }
 0x29b   : > { %1637 = vst.msk [vmem:[#allocation2 + $0x10] sm:$0xff] %vm1561_vm0, %v1633_v32 }
 0x29c   : > { %v1634_v34 = vadd.f32 %v3385_v20, %v1624_v33 }
 0x29e   : > { %1638 = vst.msk [vmem:[#allocation2 + $0x18] sm:$0xff] %vm1561_vm0, %v1634_v34 }
 0x29f PF: > { %s4703_s19 = sld [smem:[#allocation9_spill]]  ;;  %v3878_v35 = vld [vmem:[%s4149_s2] sm:$0xff]   ;;  %v3880_v37 = vld [vmem:[%s4149_s2 + $0x8] sm:$0xff]   ;;  %vm1668_vm1 = vcmask 261120   ;;  %s4704_s29 = sld [smem:[#allocation10_spill]]  ;;  %v3986_v47 = vmov 0.0  }
 0x2a0   : > { %3621 = vmatprep.subr.bf16.mxu1 %v3878_v35  ;;  %v4402_v39 = vld [vmem:[#allocation2] sm:$0xff]  ;;  %v3883_v46 = vld [vmem:[%s4164_s6 + $0x8] sm:$0xff]   ;;  %vm3987_vm2 = vmmov 0   ;;  %vm1878_vm3 = vcmask 130048   ;;  %s4707_s7 = sld [smem:[#allocation24_spill]]  ;;  %s4709_s30 = sld [smem:[#allocation25_spill]] }
 0x2a1   : > { %3622 = vmatpush3.bf16.msra.mxu1 %v3878_v35  ;;  %v4404_v40 = vld [vmem:[#allocation2 + $0x8] sm:$0xff]  ;;  %v3882_v45 = vld [vmem:[%s4164_s6] sm:$0xff]   ;;  %s4711_s18 = sld [smem:[#allocation27_spill]]  ;;  %vm2913_vm4 = vcmask 523264  }
 0x2a2   : > { %3623 = vmatprep.subr.bf16.mxu1 %v3880_v37  ;;  %v4406_v41 = vld [vmem:[#allocation2 + $0x10] sm:$0xff]  ;;  %v4410_v42 = vpack.c.bf16 %v4404_v40, %v4402_v39  ;;  %v3391_v50 = vld [vmem:[%s4159_s24] ss:$0 sm:$0xff] }
 0x2a3   : > { %v3396_v9 = vld [vmem:[%s4169_s3] ss:$0 sm:$0xff] }
 0x2a4   : > { %3625 = vmatprep.mubr.msk.bf16.mxu1 %vm1668_vm1, %v4410_v42  ;;  %3617 = vmatprep.mubr.msk.bf16.mxu0 %vm1668_vm1, %v4410_v42 }
 0x2a5   : > { %v3879_v36 = vld [vmem:[%s4703_s19] sm:$0xff]   ;;  %v3881_v38 = vld [vmem:[%s4703_s19 + $0x8] sm:$0xff]   ;;  %v4412_v43 = vld [vmem:[#allocation2 + $0x18] sm:$0xff]  ;;  %3624 = vmatpush3.bf16.msra.mxu1 %v3880_v37 }
 0x2a6   : > { %3613 = vmatprep.subr.bf16.mxu0 %v3879_v36  ;;  %v4416_v44 = vpack.c.bf16 %v4412_v43, %v4406_v41  ;;  %3637 = vmatprep.subr.bf16.mxu1 %v3986_v47  ;;  %v3386_v48 = vld [vmem:[%s4704_s29] ss:$0 sm:$0xff]  ;;  %s4708_s26 = scalar_lea.vmem %s4707_s7, %s4132_s4  ;;  %s4710_s21 = scalar_lea.vmem %s4709_s30, %s4132_s4 }
 0x2a7   : > { %3614 = vmatpush3.bf16.msra.mxu0 %v3879_v36  ;;  %s4712_s1 = scalar_lea.vmem %s4711_s18, %s4132_s4 }
 0x2a8   : > { %3615 = vmatprep.subr.bf16.mxu0 %v3881_v38  ;;  %3626 = vmatmul.mubr.msk.bf16.vlgmr.msra.gmra.mrb[0].mxu1 %vm1668_vm1, %v4416_v44 }
 0x2a9   : > { %3639 = vmatprep.mubr.msk.bf16.mxu1 %vm3987_vm2, %v3986_v47 }
 0x2ab   : > { %3616 = vmatpush3.bf16.msra.mxu0 %v3881_v38 }
 0x2ac   : > { %3629 = vmatprep.subr.bf16.mxu0 %v3882_v45 }
 0x2ae   : > { %3618 = vmatmul.mubr.msk.bf16.vlgmr.msra.gmra.mrb[0].mxu0 %vm1668_vm1, %v4416_v44 }
 0x2af   : > { %3630 = vmatpush3.bf16.msra.mxu0 %v3882_v45  ;;  %3633 = vmatprep.mubr.msk.bf16.mxu0 %vm1668_vm1, %v4410_v42 }
 0x2b0   : > { %3631 = vmatprep.subr.bf16.mxu0 %v3883_v46 }
 0x2b3   : > { %3632 = vmatpush3.bf16.msra.mxu0 %v3883_v46 }
 0x2b4   : > { %3643 = vmatprep.subr.bf16.mxu0 %v3986_v47 }
 0x2b6   : > { %3634 = vmatmul.mubr.msk.bf16.vlgmr.msra.gmra.mrb[4].mxu0 %vm1668_vm1, %v4416_v44 }
 0x2b7   : > { %3645 = vmatprep.mubr.msk.bf16.mxu0 %vm3987_vm2, %v3986_v47 }
 0x37b   : > { %v3627_v49 = vpop.f32.mrb[0].mxu1 }
 0x37c   : > { %v1781_v51 = vpop.f32.mrb[1].mxu1  ;;  %v1790_v56 = vadd.f32 %v3627_v49, %v3391_v50 }
 0x37d   : > { %v3628_v53 = vpop.f32.mrb[2].mxu1  ;;  %v1782_v61 = vadd.f32 %v3391_v50, %v1781_v51 }
 0x37e   : > { %v1793_v57 = vadd.f32 %v3628_v53, %v3391_v50  ;;  %v1784_v58 = vpop.f32.mrb[3].mxu1 }
 0x37f   : > { %v1785_v63 = vadd.f32 %v3391_v50, %v1784_v58 }
 0x380   : > { %v1875_v2 = vpack.c.bf16 %v1793_v57, %v1790_v56 }
 0x381   : > { %v3619_v52 = vpop.f32.mrb[0].mxu0  ;;  %v1874_v5 = vpack.c.bf16 %v1785_v63, %v1782_v61  ;;  %v3885_v63 = vld [vmem:[%s4703_s19 + $0x10] sm:$0xff]  }
 0x382   : > { %v1718_v54 = vadd.f32 %v3619_v52, %v3386_v48  ;;  %v1709_v55 = vpop.f32.mrb[1].mxu0  ;;  %v1930_v8 = vsel %vm1878_vm3, %v1875_v2, 0 }
 0x383   : > { %v1710_v59 = vadd.f32 %v3386_v48, %v1709_v55  ;;  %v3620_v60 = vpop.f32.mrb[2].mxu0  ;;  %3644 = vmatpush3.bf16.xpose.msra.mxu0 %v1930_v8  ;;  %v1883_v11 = vsel %vm1878_vm3, %v1874_v5, 0 }
 0x384   : > { %v1870_v62 = vmul.f32 0.25, %v1718_v54  ;;  %v1721_v0 = vadd.f32 %v3620_v60, %v3386_v48  ;;  %v1712_v1 = vpop.f32.mrb[3].mxu0  ;;  %3638 = vmatpush3.bf16.xpose.msra.mxu1 %v1883_v11  ;;  %3655 = vmatprep.subr.bf16.mxu0 %v3986_v47  ;;  %v3886_v11 = vld [vmem:[%s4149_s2 + $0x18] sm:$0xff]  }
 0x385   : > { %v1868_v3 = vmul.f32 0.25, %v1710_v59  ;;  %v1713_v4 = vadd.f32 %v3386_v48, %v1712_v1  ;;  %3649 = vmatprep.subr.bf16.mxu1 %v3986_v47 }
 0x386   : > { %v1871_v6 = vmul.f32 0.25, %v1721_v0 }
 0x387   : > { %v1869_v7 = vmul.f32 0.25, %v1713_v4 }
 0x388   : > { %v1873_v10 = vpack.c.bf16 %v1871_v6, %v1870_v62  ;;  %v3884_v62 = vld [vmem:[%s4149_s2 + $0x10] sm:$0xff]  }
 0x389   : > { %v1872_v12 = vpack.c.bf16 %v1869_v7, %v1868_v3  ;;  %v3635_v13 = vpop.f32.mrb[4].mxu0 }
 0x38a   : > { %v1862_v14 = vadd.f32 %v3635_v13, %v3396_v9  ;;  %v1853_v15 = vpop.f32.mrb[5].mxu0  ;;  %3646 = vmatmul.mubr.msk.bf16.vlgmr.msra.gmra.mrb[8].mxu0 %vm1878_vm3, %v1873_v10 }
 0x38b   : > { %v1854_v16 = vadd.f32 %v3396_v9, %v1853_v15  ;;  %v3636_v17 = vpop.f32.mrb[6].mxu0  ;;  %3640 = vmatmul.mubr.msk.bf16.vlgmr.msra.gmra.mrb[4].mxu1 %vm1878_vm3, %v1872_v12  ;;  %3657 = vmatprep.mubr.msk.bf16.mxu0 %vm3987_vm2, %v3986_v47  ;;  %v3887_v15 = vld [vmem:[%s4703_s19 + $0x18] sm:$0xff]  }
 0x38c   : > { %v1865_v18 = vadd.f32 %v3636_v17, %v3396_v9  ;;  %v1856_v19 = vpop.f32.mrb[7].mxu0  ;;  %3651 = vmatprep.mubr.msk.bf16.mxu1 %vm3987_vm2, %v3986_v47  ;;  %v3889_v17 = vld [vmem:[%s4164_s6 + $0x18] sm:$0xff]  }
 0x38d   : > { %v1857_v20 = vadd.f32 %v3396_v9, %v1856_v19 }
 0x38e   : > { %v1877_v21 = vpack.c.bf16 %v1865_v18, %v1862_v14 }
 0x38f   : > { %v1876_v22 = vpack.c.bf16 %v1857_v20, %v1854_v16  ;;  %v3888_v16 = vld [vmem:[%s4164_s6 + $0x10] sm:$0xff]  }
 0x390   : > { %3656 = vmatpush3.bf16.msra.mxu0 %v1877_v21 }
 0x391   : > { %3650 = vmatpush3.bf16.msra.mxu1 %v1876_v22  ;;  %3669 = vmatprep.subr.bf16.mxu0 %v3884_v62 }
 0x392   : > { %3661 = vmatprep.subr.bf16.mxu1 %v3885_v63 }
 0x45d   : > { %v1966_v23 = vpop.f32.mrb[8].mxu0 }
 0x45e   : > { %v1919_v24 = vpop.f32.mrb[4].mxu1  ;;  %v3647_v25 = vpop.f32.mrb[9].mxu0  ;;  %v1979_v26 = vsel %vm1878_vm3, %v1966_v23, -inf }
 0x45f   : > { %1980 = vmax.xlane.f32.xlu0 %v1979_v26  ;;  %v3641_v27 = vpop.f32.mrb[5].mxu1  ;;  %v1969_v28 = vpop.f32.mrb[10].mxu0  ;;  %v1973_v29 = vsel %vm1878_vm3, %v1919_v24, -inf }
 0x460   : > { %v3648_v30 = vpop.f32.mrb[11].mxu0  ;;  %1974 = vmax.xlane.f32.xlu1 %v1973_v29  ;;  %v1922_v31 = vpop.f32.mrb[6].mxu1  ;;  %v1982_v33 = vsel %vm1878_vm3, %v1969_v28, -inf  ;;  %v3420_v27 = vld [vmem:[%s4159_s24 + $0x1] ss:$0 sm:$0xff]  ;;  %s4705_s24 = scalar_lea.vmem %s4635_s12, %s4132_s4 }
 0x461   : > { %v3642_v32 = vpop.f32.mrb[7].mxu1  ;;  %v1976_v34 = vsel %vm1878_vm3, %v1922_v31, -inf  ;;  %v3410_v29 = vld [vmem:[%s4704_s29 + $0x1] ss:$0 sm:$0xff] }
 0x463   : > { %1983 = vmax.xlane.f32.xlu0 %v1982_v33 }
 0x464   : > { %1977 = vmax.xlane.f32.xlu1 %v1976_v34 }
 0x4ec   : > { %v1981_v35 = vpop.xlane.xlu0 %1980 }
 0x4ed   : > { %v1987_v36 = vsub.f32 %v1966_v23, %v1981_v35  ;;  %v1975_v37 = vpop.xlane.xlu1 %1974 }
 0x4ee   : > { %v1985_v38 = vsub.f32 %v1919_v24, %v1975_v37 }
 0x4ef   : > { %v1993_v45 = vmul.f32 1.442695, %v1987_v36 }
 0x4f0   : > { %v1989_v46 = vmul.f32 1.442695, %v1985_v38  ;;  %v1984_v48 = vpop.xlane.xlu0 %1983 }
 0x4f1   : > { %3898 = vpow2.f32 %v1993_v45  ;;  %v1988_v49 = vsub.f32 %v1969_v28, %v1984_v48  ;;  %v1978_v50 = vpop.xlane.xlu1 %1977 }
 0x4f2   : > { %v1986_v51 = vsub.f32 %v1922_v31, %v1978_v50  ;;  %3900 = vpow2.f32 %v1989_v46 }
 0x4f3   : > { %v1995_v52 = vmul.f32 1.442695, %v1988_v49 }
 0x4f4   : > { %v1991_v53 = vmul.f32 1.442695, %v1986_v51 }
 0x4f5   : > { %3902 = vpow2.f32 %v1995_v52 }
 0x4f6   : > { %3904 = vpow2.f32 %v1991_v53 }
 0x4fb   : > { %v3899_v54 = vpop.eup %3898 }
 0x4fc   : > { %v2003_v55 = vsel %vm1878_vm3, %v3899_v54, 0.0  ;;  %v3901_v56 = vpop.eup %3900 }
 0x4fd   : > { %2004 = vadd.xlane.f32.xlu0 %v2003_v55  ;;  %v1997_v58 = vsel %vm1878_vm3, %v3901_v56, 0.0 }
 0x4ff   : > { %v3903_v57 = vpop.eup %3902 }
 0x500   : > { %v2006_v59 = vsel %vm1878_vm3, %v3903_v57, 0.0  ;;  %v3905_v60 = vpop.eup %3904 }
 0x501   : > { %1998 = vadd.xlane.f32.xlu0 %v1997_v58  ;;  %2007 = vadd.xlane.f32.xlu1 %v2006_v59  ;;  %v2000_v61 = vsel %vm1878_vm3, %v3905_v60, 0.0 }
 0x505   : > { %2001 = vadd.xlane.f32.xlu1 %v2000_v61  ;;  %v3430_v61 = vld [vmem:[%s4169_s3 + $0x1] ss:$0 sm:$0xff]  ;;  %s4706_s3 = sld [smem:[#allocation11_spill]] }
 0x58a   : > { %v2005_v0 = vpop.xlane.xlu0 %2004 }
 0x58b   : > { %3906 = vrcp.f32 %v2005_v0 }
 0x58e   : > { %v1999_v1 = vpop.xlane.xlu0 %1998  ;;  %v2008_v2 = vpop.xlane.xlu1 %2007 }
 0x58f   : > { %3908 = vrcp.f32 %v2008_v2 }
 0x590   : > { %3910 = vrcp.f32 %v1999_v1 }
 0x592   : > { %v2002_v3 = vpop.xlane.xlu1 %2001 }
 0x593   : > { %3912 = vrcp.f32 %v2002_v3 }
 0x595   : > { %v3907_v4 = vpop.eup %3906 }
 0x596   : > { %v2015_v7 = vmul.f32 %v3907_v4, %v3899_v54 }
 0x599   : > { %v3909_v5 = vpop.eup %3908 }
 0x59a   : > { %v3911_v6 = vpop.eup %3910  ;;  %v2016_v8 = vmul.f32 %v3909_v5, %v3903_v57 }
 0x59b   : > { %v2013_v12 = vmul.f32 %v3911_v6, %v3901_v56 }
 0x59c   : > { %v2018_v10 = vpack.c.bf16 %v2016_v8, %v2015_v7 }
 0x59d   : > { %v3913_v9 = vpop.eup %3912 }
 0x59e   : > { %v2014_v13 = vmul.f32 %v3913_v9, %v3905_v60  ;;  %3658 = vmatmul.mubr.msk.bf16.vlgmr.msra.gmra.mrb[12].mxu0 %vm1878_vm3, %v2018_v10 }
 0x59f   : > { %3670 = vmatpush3.bf16.msra.mxu0 %v3884_v62  ;;  %3673 = vmatprep.mubr.msk.bf16.mxu0 %vm1668_vm1, %v4410_v42 }
 0x5a0   : > { %v2017_v14 = vpack.c.bf16 %v2014_v13, %v2013_v12  ;;  %3671 = vmatprep.subr.bf16.mxu0 %v3886_v11 }
 0x5a2   : > { %3652 = vmatmul.mubr.msk.bf16.vlgmr.msra.gmra.mrb[8].mxu1 %vm1878_vm3, %v2017_v14 }
 0x5a3   : > { %3662 = vmatpush3.bf16.msra.mxu1 %v3885_v63  ;;  %3665 = vmatprep.mubr.msk.bf16.mxu1 %vm1668_vm1, %v4410_v42 }
 0x5a4   : > { %3672 = vmatpush3.bf16.msra.mxu0 %v3886_v11  ;;  %3663 = vmatprep.subr.bf16.mxu1 %v3887_v15 }
 0x5a5   : > { %3685 = vmatprep.subr.bf16.mxu0 %v3986_v47 }
 0x5a7   : > { %3674 = vmatmul.mubr.msk.bf16.vlgmr.msra.gmra.mrb[16].mxu0 %vm1668_vm1, %v4416_v44  ;;  %3664 = vmatpush3.bf16.msra.mxu1 %v3887_v15 }
 0x5a8   : > { %3687 = vmatprep.mubr.msk.bf16.mxu0 %vm3987_vm2, %v3986_v47  ;;  %3677 = vmatprep.subr.bf16.mxu1 %v3888_v16 }
 0x5aa   : > { %3666 = vmatmul.mubr.msk.bf16.vlgmr.msra.gmra.mrb[12].mxu1 %vm1668_vm1, %v4416_v44 }
 0x5ab   : > { %3681 = vmatprep.mubr.msk.bf16.mxu1 %vm1668_vm1, %v4410_v42  ;;  %3678 = vmatpush3.bf16.msra.mxu1 %v3888_v16 }
 0x5ac   : > { %3679 = vmatprep.subr.bf16.mxu1 %v3889_v17 }
 0x5af   : > { %3680 = vmatpush3.bf16.msra.mxu1 %v3889_v17 }
 0x5b0   : > { %3691 = vmatprep.subr.bf16.mxu1 %v3986_v47 }
 0x5b2   : > { %3682 = vmatmul.mubr.msk.bf16.vlgmr.msra.gmra.mrb[16].mxu1 %vm1668_vm1, %v4416_v44 }
 0x5b3   : > { %3693 = vmatprep.mubr.msk.bf16.mxu1 %vm3987_vm2, %v3986_v47 }
 0x671   : > { %v4485_v18 = vpop.f32.mrb[12].mxu0 }
 0x672   : > { %v3659_v19 = vpop.f32.mrb[13].mxu0 }
 0x673   : > { %v4487_v42 = vpop.f32.mrb[14].mxu0 }
 0x674   : > { %v2108_v20 = vpack.c.bf16 %v4487_v42, %v4485_v18  ;;  %v3660_v21 = vpop.f32.mrb[15].mxu0 }
 0x675   : > { %v4491_v22 = vpop.f32.mrb[8].mxu1 }
 0x676   : > { %v3653_v23 = vpop.f32.mrb[9].mxu1 }
 0x677   : > { %v4493_v24 = vpop.f32.mrb[10].mxu1 }
 0x678   : > { %v2107_v44 = vpack.c.bf16 %v4493_v24, %v4491_v22  ;;  %v3654_v25 = vpop.f32.mrb[11].mxu1 }
 0x67a   : > { %v3675_v26 = vpop.f32.mrb[16].mxu0 }
 0x67b   : > { %v2244_v28 = vpop.f32.mrb[17].mxu0  ;;  %v2253_v31 = vadd.f32 %v3675_v26, %v3420_v27 }
 0x67c   : > { %v3676_v30 = vpop.f32.mrb[18].mxu0  ;;  %v2245_v35 = vadd.f32 %v3420_v27, %v2244_v28 }
 0x67d   : > { %v2256_v32 = vadd.f32 %v3676_v30, %v3420_v27  ;;  %v2247_v33 = vpop.f32.mrb[19].mxu0  ;;  %v3667_v34 = vpop.f32.mrb[12].mxu1 }
 0x67e   : > { %v2248_v36 = vadd.f32 %v3420_v27, %v2247_v33  ;;  %v2179_v37 = vadd.f32 %v3667_v34, %v3410_v29  ;;  %v2170_v38 = vpop.f32.mrb[13].mxu1 }
 0x67f   : > { %v2340_v45 = vpack.c.bf16 %v2256_v32, %v2253_v31  ;;  %v2171_v46 = vadd.f32 %v3410_v29, %v2170_v38  ;;  %v3668_v48 = vpop.f32.mrb[14].mxu1 }
 0x680   : > { %v2339_v49 = vpack.c.bf16 %v2248_v36, %v2245_v35  ;;  %v2335_v50 = vmul.f32 0.25, %v2179_v37  ;;  %v2182_v51 = vadd.f32 %v3668_v48, %v3410_v29  ;;  %v2173_v52 = vpop.f32.mrb[15].mxu1 }
 0x681   : > { %v2333_v53 = vmul.f32 0.25, %v2171_v46  ;;  %v2174_v54 = vadd.f32 %v3410_v29, %v2173_v52  ;;  %v2394_v55 = vsel %vm1878_vm3, %v2340_v45, 0 }
 0x682   : > { %v2336_v56 = vmul.f32 0.25, %v2182_v51  ;;  %3692 = vmatpush3.bf16.xpose.msra.mxu1 %v2394_v55  ;;  %v2347_v57 = vsel %vm1878_vm3, %v2339_v49, 0 }
 0x683   : > { %v2334_v58 = vmul.f32 0.25, %v2174_v54  ;;  %3686 = vmatpush3.bf16.xpose.msra.mxu0 %v2347_v57  ;;  %3703 = vmatprep.subr.bf16.mxu1 %v3986_v47 }
 0x684   : > { %v2338_v59 = vpack.c.bf16 %v2336_v56, %v2335_v50  ;;  %3697 = vmatprep.subr.bf16.mxu0 %v3986_v47 }
 0x685   : > { %v2337_v60 = vpack.c.bf16 %v2334_v58, %v2333_v53  ;;  %v3683_v62 = vpop.f32.mrb[16].mxu1 }
 0x686   : > { %v2327_v63 = vadd.f32 %v3683_v62, %v3430_v61  ;;  %v2318_v0 = vpop.f32.mrb[17].mxu1 }
 0x687   : > { %v2319_v1 = vadd.f32 %v3430_v61, %v2318_v0  ;;  %v3684_v2 = vpop.f32.mrb[18].mxu1  ;;  %v3890_v0 = vld [vmem:[%s4179_s23 + $0x8] sm:$0xff]  }
 0x688   : > { %v2330_v3 = vadd.f32 %v3684_v2, %v3430_v61  ;;  %v2321_v4 = vpop.f32.mrb[19].mxu1 }
 0x689   : > { %3694 = vmatmul.mubr.msk.bf16.vlgmr.msra.gmra.mrb[20].mxu1 %vm1878_vm3, %v2338_v59  ;;  %v2322_v5 = vadd.f32 %v3430_v61, %v2321_v4 }
 0x68a   : > { %3688 = vmatmul.mubr.msk.bf16.vlgmr.msra.gmra.mrb[20].mxu0 %vm1878_vm3, %v2337_v60  ;;  %3705 = vmatprep.mubr.msk.bf16.mxu1 %vm3987_vm2, %v3986_v47  ;;  %v2342_v6 = vpack.c.bf16 %v2330_v3, %v2327_v63 }
 0x68b   : > { %3699 = vmatprep.mubr.msk.bf16.mxu0 %vm3987_vm2, %v3986_v47  ;;  %v2341_v7 = vpack.c.bf16 %v2322_v5, %v2319_v1  ;;  %v3891_v1 = vld [vmem:[%s4179_s23] sm:$0xff]  }
 0x68c   : > { %3704 = vmatpush3.bf16.msra.mxu1 %v2342_v6 }
 0x68d   : > { %3698 = vmatpush3.bf16.msra.mxu0 %v2341_v7 }
 0x68e   : > { %3709 = vmatprep.subr.bf16.mxu0 %v3890_v0 }
 0x75c   : > { %v2430_v8 = vpop.f32.mrb[20].mxu1 }
 0x75d   : > { %v2383_v9 = vpop.f32.mrb[20].mxu0  ;;  %v3695_v10 = vpop.f32.mrb[21].mxu1  ;;  %v2443_v17 = vsel %vm1878_vm3, %v2430_v8, -inf }
 0x75e   : > { %v3689_v11 = vpop.f32.mrb[21].mxu0  ;;  %v2433_v12 = vpop.f32.mrb[22].mxu1  ;;  %v2437_v47 = vsel %vm1878_vm3, %v2383_v9, -inf }
 0x75f   : > { %v3696_v13 = vpop.f32.mrb[23].mxu1  ;;  %2438 = vmax.xlane.f32.xlu0 %v2437_v47  ;;  %v2386_v14 = vpop.f32.mrb[22].mxu0  ;;  %v2446_v19 = vsel %vm1878_vm3, %v2433_v12, -inf }
 0x760   : > { %v3690_v15 = vpop.f32.mrb[23].mxu0  ;;  %v2440_v16 = vsel %vm1878_vm3, %v2386_v14, -inf }
 0x761   : > { %2441 = vmax.xlane.f32.xlu1 %v2440_v16 }
 0x763   : > { %2444 = vmax.xlane.f32.xlu0 %v2443_v17 }
 0x765   : > { %2447 = vmax.xlane.f32.xlu1 %v2446_v19 }
 0x7ec   : > { %v2439_v21 = vpop.xlane.xlu0 %2438 }
 0x7ed   : > { %v2449_v23 = vsub.f32 %v2383_v9, %v2439_v21 }
 0x7ee   : > { %v2442_v25 = vpop.xlane.xlu1 %2441 }
 0x7ef   : > { %v2453_v26 = vmul.f32 1.442695, %v2449_v23  ;;  %v2450_v27 = vsub.f32 %v2386_v14, %v2442_v25 }
 0x7f0   : > { %v2445_v28 = vpop.xlane.xlu0 %2444 }
 0x7f1   : > { %3914 = vpow2.f32 %v2453_v26  ;;  %v2455_v29 = vmul.f32 1.442695, %v2450_v27  ;;  %v2451_v30 = vsub.f32 %v2430_v8, %v2445_v28 }
 0x7f2   : > { %v2448_v31 = vpop.xlane.xlu1 %2447 }
 0x7f3   : > { %3916 = vpow2.f32 %v2455_v29  ;;  %v2457_v32 = vmul.f32 1.442695, %v2451_v30  ;;  %v2452_v33 = vsub.f32 %v2433_v12, %v2448_v31  ;;  %v3447_v12 = vld [vmem:[%s4705_s24] ss:$0 sm:$0xff] }
 0x7f5   : > { %3918 = vpow2.f32 %v2457_v32  ;;  %v2459_v34 = vmul.f32 1.442695, %v2452_v33 }
 0x7f7   : > { %3920 = vpow2.f32 %v2459_v34 }
 0x7fb   : > { %v3915_v35 = vpop.eup %3914 }
 0x7fc   : > { %v2461_v36 = vsel %vm1878_vm3, %v3915_v35, 0.0 }
 0x7fd   : > { %v3917_v37 = vpop.eup %3916  ;;  %2462 = vadd.xlane.f32.xlu0 %v2461_v36 }
 0x7fe   : > { %v2464_v38 = vsel %vm1878_vm3, %v3917_v37, 0.0 }
 0x7ff   : > { %v3919_v45 = vpop.eup %3918  ;;  %2465 = vadd.xlane.f32.xlu1 %v2464_v38 }
 0x800   : > { %v2467_v46 = vsel %vm1878_vm3, %v3919_v45, 0.0 }
 0x801   : > { %v3921_v48 = vpop.eup %3920  ;;  %2468 = vadd.xlane.f32.xlu0 %v2467_v46 }
 0x802   : > { %v2470_v49 = vsel %vm1878_vm3, %v3921_v48, 0.0 }
 0x803   : > { %2471 = vadd.xlane.f32.xlu1 %v2470_v49  ;;  %v3892_v49 = vld [vmem:[%s4706_s3] sm:$0xff]  }
 0x804   : > { %3721 = vmatprep.subr.bf16.mxu1 %v3892_v49 }
 0x88a   : > { %v2463_v50 = vpop.xlane.xlu0 %2462 }
 0x88b   : > { %3922 = vrcp.f32 %v2463_v50  ;;  %v3893_v50 = vld [vmem:[%s4706_s3 + $0x8] sm:$0xff]  }
 0x88c   : > { %v2466_v51 = vpop.xlane.xlu1 %2465 }
 0x88d   : > { %3924 = vrcp.f32 %v2466_v51  ;;  %v3894_v51 = vld [vmem:[%s4201_s11] sm:$0xff]  }
 0x88e   : > { %v2469_v52 = vpop.xlane.xlu0 %2468 }
 0x88f   : > { %3926 = vrcp.f32 %v2469_v52 }
 0x890   : > { %v2472_v53 = vpop.xlane.xlu1 %2471 }
 0x891   : > { %3928 = vrcp.f32 %v2472_v53 }
 0x895   : > { %v3923_v54 = vpop.eup %3922 }
 0x896   : > { %v2477_v56 = vmul.f32 %v3923_v54, %v3915_v35 }
 0x897   : > { %v3925_v55 = vpop.eup %3924 }
 0x898   : > { %v2478_v57 = vmul.f32 %v3925_v55, %v3917_v37 }
 0x899   : > { %v3927_v58 = vpop.eup %3926 }
 0x89a   : > { %v2481_v59 = vpack.c.bf16 %v2478_v57, %v2477_v56  ;;  %v2479_v61 = vmul.f32 %v3927_v58, %v3919_v45 }
 0x89b   : > { %v3929_v60 = vpop.eup %3928 }
 0x89c   : > { %v2480_v62 = vmul.f32 %v3929_v60, %v3921_v48  ;;  %3700 = vmatmul.mubr.msk.bf16.vlgmr.msra.gmra.mrb[24].mxu0 %vm1878_vm3, %v2481_v59 }
 0x89d   : > { %3710 = vmatpush3.bf16.msra.mxu0 %v3890_v0 }
 0x89e   : > { %v2482_v63 = vpack.c.bf16 %v2480_v62, %v2479_v61  ;;  %3715 = vmatprep.subr.bf16.mxu0 %v3891_v1 }
 0x8a0   : > { %3706 = vmatmul.mubr.msk.bf16.vlgmr.msra.gmra.mrb[24].mxu1 %vm1878_vm3, %v2482_v63 }
 0x8a1   : > { %3722 = vmatpush3.bf16.msra.mxu1 %v3892_v49 }
 0x8a2   : > { %3723 = vmatprep.subr.bf16.mxu1 %v3893_v50 }
 0x8a5   : > { %3724 = vmatpush3.bf16.msra.mxu1 %v3893_v50 }
 0x8a6   : > { %3729 = vmatprep.subr.bf16.mxu1 %v3894_v51 }
 0x96f   : > { %v2520_v2 = vpop.f32.mrb[24].mxu0 }
 0x970   : > { %v3701_v3 = vpop.f32.mrb[25].mxu0 }
 0x971   : > { %v2523_v4 = vpop.f32.mrb[26].mxu0 }
 0x972   : > { %v2571_v5 = vpack.c.bf16 %v2523_v4, %v2520_v2  ;;  %v3702_v6 = vpop.f32.mrb[27].mxu0 }
 0x973   : > { %v2564_v7 = vpop.f32.mrb[24].mxu1 }
 0x974   : > { %v3707_v8 = vpop.f32.mrb[25].mxu1  ;;  %3711 = vmatprep.mubr.msk.bf16.mxu0 %vm1878_vm3, %v2571_v5 }
 0x975   : > { %v2567_v9 = vpop.f32.mrb[26].mxu1 }
 0x976   : > { %v2572_v10 = vpack.c.bf16 %v2567_v9, %v2564_v7  ;;  %v3708_v11 = vpop.f32.mrb[27].mxu1  ;;  %v3449_v7 = vld [vmem:[%s4710_s21] ss:$0 sm:$0xff] }
 0x978   : > { %3712 = vmatmul.mubr.msk.bf16.vlgmr.msra.gmra.mrb[28].mxu0 %vm1878_vm3, %v2572_v10 }
 0x979   : > { %3716 = vmatpush3.bf16.msra.mxu0 %v3891_v1  ;;  %3717 = vmatprep.mubr.msk.bf16.mxu0 %vm1878_vm3, %v2107_v44  ;;  %v3448_v1 = vld [vmem:[%s4708_s26] ss:$0 sm:$0xff] }
 0x984   : > { %3718 = vmatmul.mubr.msk.bf16.vlgmr.msra.gmra.mrb[28].mxu0 %vm1878_vm3, %v2108_v20 }
 0xa57   : > { %v3719_v47 = vpop.f32.mrb[28].mxu0 }
 0xa58   : > { %v2683_v13 = vpop.f32.mrb[29].mxu0  ;;  %v2707_v14 = vadd.f32 %v3719_v47, %v3447_v12 }
 0xa59   : > { %v2705_v15 = vadd.f32 %v3447_v12, %v2683_v13  ;;  %v3720_v16 = vpop.f32.mrb[30].mxu0 }
 0xa5a   : > { %v2686_v17 = vpop.f32.mrb[31].mxu0  ;;  %v2708_v19 = vadd.f32 %v3720_v16, %v3447_v12  ;;  %v2711_v42 = vadd.f32 %v2707_v14, %v4406_v41 }
 0xa5b   : > { %v2706_v22 = vadd.f32 %v3447_v12, %v2686_v17  ;;  %v2709_v24 = vadd.f32 %v2705_v15, %v4402_v39 }
 0xa5c   : > { %v2712_v21 = vadd.f32 %v2708_v19, %v4412_v43  ;;  %v2721_v23 = vsel %vm1668_vm1, %v2711_v42, 0.0 }
 0xa5d   : > { %v2715_v44 = vsel %vm1668_vm1, %v2709_v24, 0.0  ;;  %v2710_v18 = vadd.f32 %v2706_v22, %v4404_v40  ;;  %v3895_v22 = vld [vmem:[%s4201_s11 + $0x8] sm:$0xff]  }
 0xa5e   : > { %2716 = vadd.xlane.f32.xlu0 %v2715_v44  ;;  %v2724_v25 = vsel %vm1668_vm1, %v2712_v21, 0.0  ;;  %v3897_v44 = vld [vmem:[%s4201_s11 + $0x18] sm:$0xff]  }
 0xa5f   : > { %v2718_v20 = vsel %vm1668_vm1, %v2710_v18, 0.0 }
 0xa60   : > { %2719 = vadd.xlane.f32.xlu1 %v2718_v20 }
 0xa62   : > { %2722 = vadd.xlane.f32.xlu0 %v2721_v23 }
 0xa64   : > { %2725 = vadd.xlane.f32.xlu1 %v2724_v25 }
 0xaeb   : > { %v2717_v26 = vpop.xlane.xlu0 %2716 }
 0xaec   : > { %v2728_v39 = vmul.f32 0.03125, %v2717_v26 }
 0xaed   : > { %v2720_v27 = vpop.xlane.xlu1 %2719 }
 0xaee   : > { %v2732_v28 = vsub.f32 %v2709_v24, %v2728_v39  ;;  %v2729_v29 = vmul.f32 0.03125, %v2720_v27  ;;  %v3896_v24 = vld [vmem:[%s4201_s11 + $0x10] sm:$0xff]  }
 0xaef   : > { %v2723_v40 = vpop.xlane.xlu0 %2722 }
 0xaf0   : > { %v2733_v30 = vsub.f32 %v2710_v18, %v2729_v29  ;;  %v2730_v41 = vmul.f32 0.03125, %v2723_v40  ;;  %v2736_v31 = vmul.f32 %v2732_v28, %v2732_v28  ;;  %v3450_v18 = vld [vmem:[%s4712_s1] ss:$0 sm:$0xff] }
 0xaf1   : > { %v2726_v32 = vpop.xlane.xlu1 %2725 }
 0xaf2   : > { %v2734_v33 = vsub.f32 %v2711_v42, %v2730_v41  ;;  %v2731_v43 = vmul.f32 0.03125, %v2726_v32  ;;  %v2740_v34 = vsel %vm1668_vm1, %v2736_v31, 0.0  ;;  %v2737_v35 = vmul.f32 %v2733_v30, %v2733_v30  ;;  %v3455_v32 = vld [vmem:[%s931_s13] ss:$0 sm:$0xff] }
 0xaf3   : > { %2741 = vadd.xlane.f32.xlu0 %v2740_v34 }
 0xaf4   : > { %v2735_v36 = vsub.f32 %v2712_v21, %v2731_v43  ;;  %v2743_v37 = vsel %vm1668_vm1, %v2737_v35, 0.0  ;;  %v2738_v38 = vmul.f32 %v2734_v33, %v2734_v33 }
 0xaf5   : > { %2744 = vadd.xlane.f32.xlu1 %v2743_v37 }
 0xaf6   : > { %v2746_v45 = vsel %vm1668_vm1, %v2738_v38, 0.0  ;;  %v2739_v46 = vmul.f32 %v2735_v36, %v2735_v36 }
 0xaf7   : > { %2747 = vadd.xlane.f32.xlu0 %v2746_v45 }
 0xaf8   : > { %v2749_v48 = vsel %vm1668_vm1, %v2739_v46, 0.0 }
 0xaf9   : > { %2750 = vadd.xlane.f32.xlu1 %v2749_v48 }
 0xb80   : > { %v2742_v52 = vpop.xlane.xlu0 %2741 }
 0xb81   : > { %v2752_v53 = vmul.f32 0.03125, %v2742_v52 }
 0xb82   : > { %v2745_v54 = vpop.xlane.xlu1 %2744 }
 0xb83   : > { %v2756_v55 = vadd.f32 1e-06, %v2752_v53  ;;  %v2753_v56 = vmul.f32 0.03125, %v2745_v54 }
 0xb84   : > { %v2748_v57 = vpop.xlane.xlu0 %2747 }
 0xb85   : > { %3930 = vrsqrt.f32 %v2756_v55  ;;  %v2757_v58 = vadd.f32 1e-06, %v2753_v56  ;;  %v2754_v59 = vmul.f32 0.03125, %v2748_v57 }
 0xb86   : > { %v2751_v60 = vpop.xlane.xlu1 %2750 }
 0xb87   : > { %3932 = vrsqrt.f32 %v2757_v58  ;;  %v2758_v61 = vadd.f32 1e-06, %v2754_v59  ;;  %v2755_v62 = vmul.f32 0.03125, %v2751_v60 }
 0xb89   : > { %3934 = vrsqrt.f32 %v2758_v61  ;;  %v2759_v63 = vadd.f32 1e-06, %v2755_v62 }
 0xb8b   : > { %3936 = vrsqrt.f32 %v2759_v63 }
 0xb8f   : > { %v3931_v0 = vpop.eup %3930 }
 0xb90   : > { %v2764_v2 = vmul.f32 %v3931_v0, %v2732_v28 }
 0xb91   : > { %v3933_v3 = vpop.eup %3932 }
 0xb92   : > { %v2765_v4 = vmul.f32 %v3933_v3, %v2733_v30  ;;  %v2774_v5 = vmul.f32 %v3448_v1, %v2764_v2 }
 0xb93   : > { %v3935_v6 = vpop.eup %3934 }
 0xb94   : > { %v2766_v8 = vmul.f32 %v3935_v6, %v2734_v33  ;;  %v2775_v9 = vmul.f32 %v3448_v1, %v2765_v4  ;;  %v2784_v47 = vadd.f32 %v3449_v7, %v2774_v5 }
 0xb95   : > { %v3937_v10 = vpop.eup %3936 }
 0xb96   : > { %v2776_v11 = vmul.f32 %v3448_v1, %v2766_v8  ;;  %v2767_v12 = vmul.f32 %v3937_v10, %v2735_v36  ;;  %v2785_v13 = vadd.f32 %v3449_v7, %v2775_v9 }
 0xb98   : > { %v2777_v14 = vmul.f32 %v3448_v1, %v2767_v12  ;;  %v2788_v15 = vpack.c.bf16 %v2785_v13, %v2784_v47  ;;  %v2786_v16 = vadd.f32 %v3449_v7, %v2776_v11 }
 0xb9a   : > { %3725 = vmatprep.mubr.msk.bf16.mxu1 %vm1668_vm1, %v2788_v15  ;;  %v2787_v17 = vadd.f32 %v3449_v7, %v2777_v14 }
 0xb9c   : > { %v2789_v19 = vpack.c.bf16 %v2787_v17, %v2786_v16 }
 0xb9e   : > { %3726 = vmatmul.mubr.msk.bf16.vlgmr.msra.gmra.mrb[28].mxu1 %vm1668_vm1, %v2789_v19 }
 0xb9f   : > { %3730 = vmatpush3.bf16.msra.mxu1 %v3894_v51 }
 0xba0   : > { %3731 = vmatprep.subr.bf16.mxu1 %v3895_v22 }
 0xba3   : > { %3732 = vmatpush3.bf16.msra.mxu1 %v3895_v22 }
 0xba4   : > { %3733 = vmatprep.subr.bf16.mxu1 %v3896_v24 }
 0xba7   : > { %3734 = vmatpush3.bf16.msra.mxu1 %v3896_v24 }
 0xba8   : > { %3735 = vmatprep.subr.bf16.mxu1 %v3897_v44 }
 0xbab   : > { %3736 = vmatpush3.bf16.msra.mxu1 %v3897_v44 }
 0xc71   : > { %v3727_v42 = vpop.f32.mrb[28].mxu1 }
 0xc72   : > { %v2862_v20 = vadd.f32 %v3727_v42, %v3450_v18  ;;  %v2853_v21 = vpop.f32.mrb[29].mxu1  ;;  %v3462_v42 = vld [vmem:[%s934_s14] ss:$0 sm:$0xff]  ;;  %s4716_s14 = sld [smem:[#allocation3_spill]] }
 0xc73   : > { %v2854_v23 = vadd.f32 %v3450_v18, %v2853_v21  ;;  %v3728_v25 = vpop.f32.mrb[30].mxu1 }
 0xc74   : > { %v2865_v26 = vadd.f32 %v3728_v25, %v3450_v18  ;;  %v2856_v39 = vpop.f32.mrb[31].mxu1  ;;  %v2870_v28 = vmax.f32 %v2862_v20, 0.0 }
 0xc75   : > { %v2857_v27 = vadd.f32 %v3450_v18, %v2856_v39  ;;  %v2868_v40 = vmax.f32 %v2854_v23, 0.0  ;;  %v3463_v23 = vld [vmem:[%s937_s15] ss:$0 sm:$0xff] }
 0xc76   : > { %v2871_v29 = vmax.f32 %v2865_v26, 0.0 }
 0xc77   : > { %v2869_v30 = vmax.f32 %v2857_v27, 0.0 }
 0xc78   : > { %v2873_v41 = vpack.c.bf16 %v2871_v29, %v2870_v28  ;;  %p3464_p8 = scmp.ne.s32.totalorder %s4716_s14, 1 }
 0xc79   : > { %v2872_v31 = vpack.c.bf16 %v2869_v30, %v2868_v40 }
 0xc7b   : > { %3737 = vmatprep.mubr.msk.bf16.mxu1 %vm2913_vm4, %v2872_v31 }
 0xc7c   : > { %3738 = vmatmul.mubr.msk.bf16.vlgmr.msra.gmra.mrb[32].mxu1 %vm2913_vm4, %v2873_v41 }
 0xd4f   : > { %v3739_v33 = vpop.f32.mrb[32].mxu1 }
 0xd50   : > { %v2954_v43 = vpop.f32.mrb[33].mxu1  ;;  %v2963_v34 = vadd.f32 %v3739_v33, %v3455_v32 }
 0xd51   : > { %v2955_v35 = vadd.f32 %v3455_v32, %v2954_v43  ;;  %v3740_v36 = vpop.f32.mrb[34].mxu1 }
 0xd52   : > { %v2957_v37 = vpop.f32.mrb[35].mxu1  ;;  %v2966_v38 = vadd.f32 %v3740_v36, %v3455_v32  ;;  %v2971_v50 = vadd.f32 %v2963_v34, %v2786_v16 }
 0xd53   : > { %v2958_v45 = vadd.f32 %v3455_v32, %v2957_v37  ;;  %v2969_v46 = vadd.f32 %v2955_v35, %v2784_v47 }
 0xd54   : > { %v2972_v52 = vadd.f32 %v2966_v38, %v2787_v17  ;;  %v2981_v53 = vsel %vm1668_vm1, %v2971_v50, 0.0 }
 0xd55   : > { %v2975_v48 = vsel %vm1668_vm1, %v2969_v46, 0.0  ;;  %v2970_v49 = vadd.f32 %v2958_v45, %v2785_v13 }
 0xd56   : > { %2976 = vadd.xlane.f32.xlu0 %v2975_v48  ;;  %v2984_v54 = vsel %vm1668_vm1, %v2972_v52, 0.0 }
 0xd57   : > { %v2978_v51 = vsel %vm1668_vm1, %v2970_v49, 0.0 }
 0xd58   : > { %2979 = vadd.xlane.f32.xlu1 %v2978_v51 }
 0xd5a   : > { %2982 = vadd.xlane.f32.xlu0 %v2981_v53 }
 0xd5c   : > { %2985 = vadd.xlane.f32.xlu1 %v2984_v54 }
 0xde3   : > { %v2977_v55 = vpop.xlane.xlu0 %2976 }
 0xde4   : > { %v2987_v56 = vmul.f32 0.03125, %v2977_v55 }
 0xde5   : > { %v2980_v57 = vpop.xlane.xlu1 %2979 }
 0xde6   : > { %v2991_v58 = vsub.f32 %v2969_v46, %v2987_v56  ;;  %v2988_v59 = vmul.f32 0.03125, %v2980_v57 }
 0xde7   : > { %v2983_v60 = vpop.xlane.xlu0 %2982 }
 0xde8   : > { %v2992_v61 = vsub.f32 %v2970_v49, %v2988_v59  ;;  %v2989_v62 = vmul.f32 0.03125, %v2983_v60  ;;  %v2995_v63 = vmul.f32 %v2991_v58, %v2991_v58 }
 0xde9   : > { %v2986_v0 = vpop.xlane.xlu1 %2985 }
 0xdea   : > { %v2993_v1 = vsub.f32 %v2971_v50, %v2989_v62  ;;  %v2990_v2 = vmul.f32 0.03125, %v2986_v0  ;;  %v2999_v3 = vsel %vm1668_vm1, %v2995_v63, 0.0  ;;  %v2996_v4 = vmul.f32 %v2992_v61, %v2992_v61 }
 0xdeb   : > { %3000 = vadd.xlane.f32.xlu0 %v2999_v3 }
 0xdec   : > { %v2994_v5 = vsub.f32 %v2972_v52, %v2990_v2  ;;  %v3002_v6 = vsel %vm1668_vm1, %v2996_v4, 0.0  ;;  %v2997_v7 = vmul.f32 %v2993_v1, %v2993_v1 }
 0xded   : > { %3003 = vadd.xlane.f32.xlu1 %v3002_v6 }
 0xdee   : > { %v3005_v8 = vsel %vm1668_vm1, %v2997_v7, 0.0  ;;  %v2998_v9 = vmul.f32 %v2994_v5, %v2994_v5 }
 0xdef   : > { %3006 = vadd.xlane.f32.xlu0 %v3005_v8 }
 0xdf0   : > { %v3008_v10 = vsel %vm1668_vm1, %v2998_v9, 0.0 }
 0xdf1   : > { %3009 = vadd.xlane.f32.xlu1 %v3008_v10 }
 0xe78   : > { %v3001_v11 = vpop.xlane.xlu0 %3000 }
 0xe79   : > { %v3011_v12 = vmul.f32 0.03125, %v3001_v11 }
 0xe7a   : > { %v3004_v47 = vpop.xlane.xlu1 %3003 }
 0xe7b   : > { %v3015_v13 = vadd.f32 1e-06, %v3011_v12  ;;  %v3012_v14 = vmul.f32 0.03125, %v3004_v47 }
 0xe7c   : > { %v3007_v15 = vpop.xlane.xlu0 %3006 }
 0xe7d   : > { %3938 = vrsqrt.f32 %v3015_v13  ;;  %v3016_v16 = vadd.f32 1e-06, %v3012_v14  ;;  %v3013_v17 = vmul.f32 0.03125, %v3007_v15 }
 0xe7e   : > { %v3010_v19 = vpop.xlane.xlu1 %3009 }
 0xe7f   : > { %3940 = vrsqrt.f32 %v3016_v16  ;;  %v3017_v22 = vadd.f32 1e-06, %v3013_v17  ;;  %v3014_v24 = vmul.f32 0.03125, %v3010_v19 }
 0xe81   : > { %3942 = vrsqrt.f32 %v3017_v22  ;;  %v3018_v44 = vadd.f32 1e-06, %v3014_v24 }
 0xe83   : > { %3944 = vrsqrt.f32 %v3018_v44 }
 0xe87   : > { %v3939_v18 = vpop.eup %3938 }
 0xe88   : > { %v3023_v20 = vmul.f32 %v3939_v18, %v2991_v58 }
 0xe89   : > { %v3941_v21 = vpop.eup %3940 }
 0xe8a   : > { %v3033_v25 = vmul.f32 %v3462_v42, %v3023_v20  ;;  %v3024_v26 = vmul.f32 %v3941_v21, %v2992_v61 }
 0xe8b   : > { %v3943_v39 = vpop.eup %3942 }
 0xe8c   : > { %v3043_v27 = vadd.f32 %v3463_v23, %v3033_v25  ;;  %v3034_v28 = vmul.f32 %v3462_v42, %v3024_v26  ;;  %v3025_v29 = vmul.f32 %v3943_v39, %v2993_v1 }
 0xe8d   : > { %v3945_v40 = vpop.eup %3944 }
 0xe8e   : > { %3047 = vst.msk [vmem:[#allocation2] sm:$0xff] %vm1668_vm1, %v3043_v27  ;;  %v3044_v30 = vadd.f32 %v3463_v23, %v3034_v28  ;;  %v3035_v41 = vmul.f32 %v3462_v42, %v3025_v29  ;;  %v3026_v31 = vmul.f32 %v3945_v40, %v2994_v5  ;;  %3054 = sbr.rel (%p3464_p8) target bundleno = 3733 (0xe95), region = 112  ;;  %3055 = vst.msk [vmem:[%s4218_s16] sm:$0xff] (!%p3464_p8), %vm1668_vm1, %v3043_v27 }
 0xe90   : > { %3048 = vst.msk [vmem:[#allocation2 + $0x8] sm:$0xff] %vm1668_vm1, %v3044_v30  ;;  %v3045_v32 = vadd.f32 %v3463_v23, %v3035_v41  ;;  %v3036_v33 = vmul.f32 %v3462_v42, %v3026_v31  ;;  %3056 = vst.msk [vmem:[%s4218_s16 + $0x8] sm:$0xff] (!%p3464_p8), %vm1668_vm1, %v3044_v30 }
 0xe92   : > { %3049 = vst.msk [vmem:[#allocation2 + $0x10] sm:$0xff] %vm1668_vm1, %v3045_v32  ;;  %v3046_v43 = vadd.f32 %v3463_v23, %v3036_v33  ;;  %3057 = vst.msk [vmem:[%s4218_s16 + $0x10] sm:$0xff] (!%p3464_p8), %vm1668_vm1, %v3045_v32 }
 0xe94   : > { %3050 = vst.msk [vmem:[#allocation2 + $0x18] sm:$0xff] %vm1668_vm1, %v3046_v43  ;;  %3058 = vst.msk [vmem:[%s4218_s16 + $0x18] sm:$0xff] (!%p3464_p8), %vm1668_vm1, %v3046_v43 }
 0xe95 PF: > { %s4717_s15 = sld [smem:[#allocation6_spill]]  ;;  %s4718_s2 = sld [smem:[#allocation4_spill]] }
 0xe96   : > { %s4719_s25 = sld [smem:[#allocation5_spill]]  ;;  %s4720_s26 = sld [smem:[#allocation7_spill]] }
 0xe97   : > { %s4721_s27 = sld [smem:[#allocation8_spill]] }
 0xe9b   : > { %s31_s3 = sadd.s32 1, %s4717_s15  }
 0xe9c   : > { %p28_p9 = scmp.ge.s32.totalorder %s31_s3, 6  }
 0xe9e   :  { %30 = sbr.rel (!%p28_p9) target bundleno = 21 (0x15), region = 197 }

</bundles_post_ra>
